<compile_context>
chip_gen: v7x
topology: tpu7x:2x2x1
jax: 0.10.0
libtpu: 0.0.40
codegen_flags: <defaults>
</compile_context>

<pallas_src>
from functools import partial

import numpy as np
import jax
import jax.numpy as jnp
from jax.experimental import pallas as pl
from jax.experimental.pallas import tpu as pltpu


def _contract(w, x):
    """(Cout, Cin) x (Cin, L) -> (Cout, L) in f32.

    Large contractions go to the MXU at default precision (per review: no
    HIGHEST multi-pass emulation).  Tiny channel counts use an exact-f32 VPU
    broadcast-FMA fallback (also keeps the small-shape self-test exact).
    """
    c_out, c_in = w.shape
    if c_in >= 16 and c_out >= 8:
        return jnp.dot(w, x, preferred_element_type=jnp.float32)
    acc = w[:, 0:1] * x[0:1, :]
    for c in range(1, c_in):
        acc = acc + w[:, c:c + 1] * x[c:c + 1, :]
    return acc


def _conv3x3(x, w_taps, masks, W):
    """3x3 'SAME' conv, channels-on-sublane / flattened-spatial-on-lane.

    x      : (Cin, L)      L = bt*H*W (bt images concatenated along lanes)
    w_taps : (9*Cout, Cin) tap k = kh*3+kw occupies rows [k*Cout, (k+1)*Cout)
    masks  : (9, L)        1.0 where the tap stays inside its own image
    Channel-reduce FIRST (one contraction), then 9 lane rolls (XLU) + masks on
    the reduced rows only.  The masks also kill every cross-image wrap, so the
    roll over the concatenated lane axis is exact.
    """
    c_out = w_taps.shape[0] // 9
    L = x.shape[1]
    t = _contract(w_taps, x)                           # (9*Cout, L)
    acc = t[4 * c_out:5 * c_out, :]                    # center tap: no shift/mask
    for k in range(9):
        if k == 4:
            continue
        off = (k // 3 - 1) * W + (k % 3 - 1)
        tap = t[k * c_out:(k + 1) * c_out, :]
        tap = pltpu.roll(tap, (-off) % L, axis=1) * masks[k:k + 1, :]
        acc = acc + tap
    return acc


def _scale_aware_kernel(W, xl_ref, xh_ref, w1l_ref, w1h_ref, b1_ref,
                        w31_ref, b31_ref, w32d_ref, b32d_ref, mask_ref,
                        out_ref):
    xl = xl_ref[...].astype(jnp.float32)               # (C, L)
    xh = xh_ref[...].astype(jnp.float32)
    masks = mask_ref[...]                               # (9, L)

    # 1x1 conv over the (virtual) channel concat [x_l; x_h] with pre-split
    # weight halves, + bias + ReLU.
    feat = _contract(w1l_ref[...], xl) + _contract(w1h_ref[...], xh) + b1_ref[...]
    feat = jnp.maximum(feat, 0.0)                       # (C, L)

    # 3x3 conv C -> C//2 (zero-padded to a multiple of 8) + bias + ReLU.
    feat = jnp.maximum(_conv3x3(feat, w31_ref[...], masks, W) + b31_ref[...], 0.0)

    # 3x3 conv folded to the softmax "difference" channel: C//2 -> 1 logit;
    # softmax over 2 channels == sigmoid(logit0 - logit1).
    att_d = _conv3x3(feat, w32d_ref[...], masks, W) + b32d_ref[...]   # (1, L)
    a_l = jax.nn.sigmoid(att_d)

    # fusion = a*x_l + (1-a)*x_h == x_h + a*(x_l - x_h)
    out_ref[...] = (xh + a_l * (xl - xh)).astype(out_ref.dtype)


def scale_aware(x_l, x_h, params, *, block_images=None):
    B, C, H, W = x_l.shape
    assert x_h.shape == x_l.shape
    assert C % 2 == 0, "in_channels must be even (conv3x3_1 outputs C//2)"
    HW = H * W
    N = B * HW
    c_mid = C // 2
    c_mid_p = max(8, ((c_mid + 7) // 8) * 8)     # align conv3x3_1 tap slices

    # ---- fold batch into the lane axis: (B,C,H,W) -> (C, B*HW) ----
    xl = x_l.reshape(B, C, HW).transpose(1, 0, 2).reshape(C, N)
    xh = x_h.reshape(B, C, HW).transpose(1, 0, 2).reshape(C, N)

    # ---- parameters repackaged host-side (once) ----
    w1 = params["w_conv1x1"].reshape(C, 2 * C).astype(jnp.float32)
    w1l, w1h = w1[:, :C], w1[:, C:]                               # pre-split halves
    b1 = params["b_conv1x1"].reshape(C, 1).astype(jnp.float32)

    w31 = jnp.transpose(params["w_conv3x3_1"], (2, 3, 0, 1)).reshape(9, c_mid, C)
    w31 = jnp.pad(w31, ((0, 0), (0, c_mid_p - c_mid), (0, 0)))
    w31 = w31.reshape(9 * c_mid_p, C).astype(jnp.float32)         # (9*c_mid_p, C)
    b31 = jnp.pad(params["b_conv3x3_1"], (0, c_mid_p - c_mid))
    b31 = b31.reshape(c_mid_p, 1).astype(jnp.float32)

    wd = params["w_conv3x3_2"][0] - params["w_conv3x3_2"][1]      # (c_mid,3,3)
    wd = jnp.transpose(wd, (1, 2, 0)).reshape(9, c_mid)
    w32d = jnp.pad(wd, ((0, 0), (0, c_mid_p - c_mid))).astype(jnp.float32)
    b32d = (params["b_conv3x3_2"][0] - params["b_conv3x3_2"][1]
            ).reshape(1, 1).astype(jnp.float32)

    # ---- per-image "SAME"-padding tap masks (no div/mod inside the kernel) ----
    hh = np.arange(HW, dtype=np.int64) // W
    ww = np.arange(HW, dtype=np.int64) % W
    masks_np = np.stack([
        ((hh + (k // 3 - 1) >= 0) & (hh + (k // 3 - 1) < H) &
         (ww + (k % 3 - 1) >= 0) & (ww + (k % 3 - 1) < W)).astype(np.float32)
        for k in range(9)])                                       # (9, HW)

    # ---- block sizing: images per lane block, intermediates included ----
    itemsize = jnp.dtype(x_l.dtype).itemsize
    per_image = HW * (
        2 * 3 * C * itemsize                      # x_l + x_h + out, double-buffered
        + 4 * (4 * C + 10 * c_mid_p + 11)         # f32 casts, feat, tap stacks, att
        + 2 * 9 * 4)                              # edge masks
    if block_images is None:
        budget = 12 << 20
        bt = max(1, min(B, budget // max(per_image, 1)))
        if B > 1:
            bt = min(bt, B // 2)                  # keep >= 2 grid steps (megacore/v7x)
        while B % bt:
            bt -= 1
    else:
        bt = block_images
        assert B % bt == 0
    # block lane width must be a multiple of 128 unless it spans all lanes
    if bt < B and (bt * HW) % 128 != 0:
        ok = [t for t in range(bt, 0, -1) if B % t == 0 and (t * HW) % 128 == 0]
        bt = ok[0] if ok else B
    L = bt * HW
    grid = (B // bt,)
    # TODO(synk): very large single images (per-image f32 intermediates beyond
    # the VMEM budget, worst on v7x's 64 MiB) need a second grid axis over
    # row-blocks with a 1-row halo; not implemented here.

    masks = jnp.asarray(np.tile(masks_np, (1, bt)))               # (9, L)
    vmem_limit = int(min(64 << 20, max(16 << 20, bt * per_image + (8 << 20))))

    io_map = lambda i: (0, i)
    w_map = lambda i: (0, 0)

    out = pl.pallas_call(
        partial(_scale_aware_kernel, W),
        out_shape=jax.ShapeDtypeStruct((C, N), x_l.dtype),
        grid=grid,
        in_specs=[
            pl.BlockSpec((C, L), io_map),                # x_l
            pl.BlockSpec((C, L), io_map),                # x_h
            pl.BlockSpec((C, C), w_map),                 # conv1x1 weight, x_l half
            pl.BlockSpec((C, C), w_map),                 # conv1x1 weight, x_h half
            pl.BlockSpec((C, 1), w_map),                 # conv1x1 bias
            pl.BlockSpec((9 * c_mid_p, C), w_map),       # conv3x3_1 taps (stacked)
            pl.BlockSpec((c_mid_p, 1), w_map),           # conv3x3_1 bias
            pl.BlockSpec((9, c_mid_p), w_map),           # conv3x3_2 diff taps
            pl.BlockSpec((1, 1), w_map),                 # conv3x3_2 diff bias
            pl.BlockSpec((9, L), w_map),                 # edge masks
        ],
        out_specs=pl.BlockSpec((C, L), io_map),
        compiler_params=pltpu.CompilerParams(
            dimension_semantics=("parallel",),
            vmem_limit_bytes=vmem_limit),
    )(xl, xh, w1l, w1h, b1, w31, b31, w32d, b32d, masks)

    # undo the wrapper-side layout plumbing: (C, B*HW) -> (B, C, H, W)
    return out.reshape(C, B, HW).transpose(1, 0, 2).reshape(B, C, H, W)


# ----------------------------- reference & test -----------------------------

def _conv2d_ref(x, w, b, pad):
    y = jax.lax.conv_general_dilated(
        x, w, (1, 1), [(pad, pad), (pad, pad)],
        dimension_numbers=("NCHW", "OIHW", "NCHW"),
        precision=jax.lax.Precision.HIGHEST)
    return y + b[None, :, None, None]


def reference(x_l, x_h, p):
    """Pure-JAX replica of Scale_Aware.forward."""
    feat = jnp.concatenate([x_l, x_h], axis=1)
    feat = jax.nn.relu(_conv2d_ref(feat, p["w_conv1x1"], p["b_conv1x1"], 0))
    feat = jax.nn.relu(_conv2d_ref(feat, p["w_conv3x3_1"], p["b_conv3x3_1"], 1))
    att = _conv2d_ref(feat, p["w_conv3x3_2"], p["b_conv3x3_2"], 1)
    att = jax.nn.softmax(att, axis=1)
    return att[:, 0:1] * x_l + att[:, 1:2] * x_h


def init_params(key, c):
    c_mid = c // 2
    ks = jax.random.split(key, 6)
    return dict(
        w_conv1x1=jax.random.normal(ks[0], (c, 2 * c, 1, 1), jnp.float32) * 0.3,
        b_conv1x1=jax.random.normal(ks[1], (c,), jnp.float32) * 0.1,
        w_conv3x3_1=jax.random.normal(ks[2], (c_mid, c, 3, 3), jnp.float32) * 0.2,
        b_conv3x3_1=jax.random.normal(ks[3], (c_mid,), jnp.float32) * 0.1,
        w_conv3x3_2=jax.random.normal(ks[4], (2, c_mid, 3, 3), jnp.float32) * 0.2,
        b_conv3x3_2=jax.random.normal(ks[5], (2,), jnp.float32) * 0.1,
    )


if __name__ == "__main__":
    key = jax.random.PRNGKey(0)
    kl, kh, kp = jax.random.split(key, 3)
    B, C, H, W = 2, 4, 16, 16
    x_l = jax.random.normal(kl, (B, C, H, W), jnp.float32)
    x_h = jax.random.normal(kh, (B, C, H, W), jnp.float32)
    params = init_params(kp, C)

    out = scale_aware(x_l, x_h, params)
    jax.block_until_ready(out)

    ref = reference(x_l, x_h, params)
    assert out.shape == (B, C, H, W)
    err = float(jnp.max(jnp.abs(out - ref)))
    # At these channel counts every contraction runs on the exact-f32 VPU
    # path; large-C configs use the MXU at default (bf16-pass) precision.
    assert err < 1e-3, err

    print("KERNEL_OK")
</pallas_src>

<mosaic_0001>
module attributes {stable_mosaic.version = 11 : i64} {
  func.func @_scale_aware_kernel(%arg0: i32, %arg1: memref<4x256xf32, #tpu.memory_space<vmem>>, %arg2: memref<4x256xf32, #tpu.memory_space<vmem>>, %arg3: memref<4x4xf32, #tpu.memory_space<vmem>>, %arg4: memref<4x4xf32, #tpu.memory_space<vmem>>, %arg5: memref<4x1xf32, #tpu.memory_space<vmem>>, %arg6: memref<72x4xf32, #tpu.memory_space<vmem>>, %arg7: memref<8x1xf32, #tpu.memory_space<vmem>>, %arg8: memref<9x8xf32, #tpu.memory_space<vmem>>, %arg9: memref<1x1xf32, #tpu.memory_space<vmem>>, %arg10: memref<9x256xf32, #tpu.memory_space<vmem>>, %arg11: memref<4x256xf32, #tpu.memory_space<vmem>>) attributes {dimension_semantics = [#tpu.dimension_semantics<parallel>], iteration_bounds = array<i64: 2>, scalar_prefetch = 0 : i64, scratch_operands = 0 : i64, tpu.core_type = #tpu.core_type<tc>, window_params = [{transform_indices = @transform_0, window_bounds = array<i64: 4, 256>}, {transform_indices = @transform_1, window_bounds = array<i64: 4, 256>}, {pipeline_mode = #tpu.pipeline_mode<synchronous>, transform_indices = @transform_2, window_bounds = array<i64: 4, 4>}, {pipeline_mode = #tpu.pipeline_mode<synchronous>, transform_indices = @transform_3, window_bounds = array<i64: 4, 4>}, {pipeline_mode = #tpu.pipeline_mode<synchronous>, transform_indices = @transform_4, window_bounds = array<i64: 4, 1>}, {pipeline_mode = #tpu.pipeline_mode<synchronous>, transform_indices = @transform_5, window_bounds = array<i64: 72, 4>}, {pipeline_mode = #tpu.pipeline_mode<synchronous>, transform_indices = @transform_6, window_bounds = array<i64: 8, 1>}, {pipeline_mode = #tpu.pipeline_mode<synchronous>, transform_indices = @transform_7, window_bounds = array<i64: 9, 8>}, {pipeline_mode = #tpu.pipeline_mode<synchronous>, transform_indices = @transform_8, window_bounds = array<i64: 1, 1>}, {pipeline_mode = #tpu.pipeline_mode<synchronous>, transform_indices = @transform_9, window_bounds = array<i64: 9, 256>}, {transform_indices = @transform_10, window_bounds = array<i64: 4, 256>}]} {
    %c0 = arith.constant 0 : index
    %c0_0 = arith.constant 0 : index
    %0 = vector.load %arg1[%c0, %c0_0] : memref<4x256xf32, #tpu.memory_space<vmem>>, vector<4x256xf32>
    %c0_1 = arith.constant 0 : index
    %c0_2 = arith.constant 0 : index
    %1 = vector.load %arg2[%c0_1, %c0_2] : memref<4x256xf32, #tpu.memory_space<vmem>>, vector<4x256xf32>
    %c0_3 = arith.constant 0 : index
    %c0_4 = arith.constant 0 : index
    %2 = vector.load %arg10[%c0_3, %c0_4] : memref<9x256xf32, #tpu.memory_space<vmem>>, vector<9x256xf32>
    %c0_5 = arith.constant 0 : index
    %c0_6 = arith.constant 0 : index
    %3 = vector.load %arg3[%c0_5, %c0_6] : memref<4x4xf32, #tpu.memory_space<vmem>>, vector<4x4xf32>
    %4 = vector.extract_strided_slice %3 {offsets = [0, 0], sizes = [4, 1], strides = [1, 1]} : vector<4x4xf32> to vector<4x1xf32>
    %5 = vector.extract_strided_slice %0 {offsets = [0, 0], sizes = [1, 256], strides = [1, 1]} : vector<4x256xf32> to vector<1x256xf32>
    %6 = vector.broadcast %4 : vector<4x1xf32> to vector<4x256xf32>
    %7 = vector.broadcast %5 : vector<1x256xf32> to vector<4x256xf32>
    %8 = arith.mulf %6, %7 : vector<4x256xf32>
    %9 = vector.extract_strided_slice %3 {offsets = [0, 1], sizes = [4, 1], strides = [1, 1]} : vector<4x4xf32> to vector<4x1xf32>
    %10 = vector.extract_strided_slice %0 {offsets = [1, 0], sizes = [1, 256], strides = [1, 1]} : vector<4x256xf32> to vector<1x256xf32>
    %11 = vector.broadcast %9 : vector<4x1xf32> to vector<4x256xf32>
    %12 = vector.broadcast %10 : vector<1x256xf32> to vector<4x256xf32>
    %13 = arith.mulf %11, %12 : vector<4x256xf32>
    %14 = arith.addf %8, %13 : vector<4x256xf32>
    %15 = vector.extract_strided_slice %3 {offsets = [0, 2], sizes = [4, 1], strides = [1, 1]} : vector<4x4xf32> to vector<4x1xf32>
    %16 = vector.extract_strided_slice %0 {offsets = [2, 0], sizes = [1, 256], strides = [1, 1]} : vector<4x256xf32> to vector<1x256xf32>
    %17 = vector.broadcast %15 : vector<4x1xf32> to vector<4x256xf32>
    %18 = vector.broadcast %16 : vector<1x256xf32> to vector<4x256xf32>
    %19 = arith.mulf %17, %18 : vector<4x256xf32>
    %20 = arith.addf %14, %19 : vector<4x256xf32>
    %21 = vector.extract_strided_slice %3 {offsets = [0, 3], sizes = [4, 1], strides = [1, 1]} : vector<4x4xf32> to vector<4x1xf32>
    %22 = vector.extract_strided_slice %0 {offsets = [3, 0], sizes = [1, 256], strides = [1, 1]} : vector<4x256xf32> to vector<1x256xf32>
    %23 = vector.broadcast %21 : vector<4x1xf32> to vector<4x256xf32>
    %24 = vector.broadcast %22 : vector<1x256xf32> to vector<4x256xf32>
    %25 = arith.mulf %23, %24 : vector<4x256xf32>
    %26 = arith.addf %20, %25 : vector<4x256xf32>
    %c0_7 = arith.constant 0 : index
    %c0_8 = arith.constant 0 : index
    %27 = vector.load %arg4[%c0_7, %c0_8] : memref<4x4xf32, #tpu.memory_space<vmem>>, vector<4x4xf32>
    %28 = vector.extract_strided_slice %27 {offsets = [0, 0], sizes = [4, 1], strides = [1, 1]} : vector<4x4xf32> to vector<4x1xf32>
    %29 = vector.extract_strided_slice %1 {offsets = [0, 0], sizes = [1, 256], strides = [1, 1]} : vector<4x256xf32> to vector<1x256xf32>
    %30 = vector.broadcast %28 : vector<4x1xf32> to vector<4x256xf32>
    %31 = vector.broadcast %29 : vector<1x256xf32> to vector<4x256xf32>
    %32 = arith.mulf %30, %31 : vector<4x256xf32>
    %33 = vector.extract_strided_slice %27 {offsets = [0, 1], sizes = [4, 1], strides = [1, 1]} : vector<4x4xf32> to vector<4x1xf32>
    %34 = vector.extract_strided_slice %1 {offsets = [1, 0], sizes = [1, 256], strides = [1, 1]} : vector<4x256xf32> to vector<1x256xf32>
    %35 = vector.broadcast %33 : vector<4x1xf32> to vector<4x256xf32>
    %36 = vector.broadcast %34 : vector<1x256xf32> to vector<4x256xf32>
    %37 = arith.mulf %35, %36 : vector<4x256xf32>
    %38 = arith.addf %32, %37 : vector<4x256xf32>
    %39 = vector.extract_strided_slice %27 {offsets = [0, 2], sizes = [4, 1], strides = [1, 1]} : vector<4x4xf32> to vector<4x1xf32>
    %40 = vector.extract_strided_slice %1 {offsets = [2, 0], sizes = [1, 256], strides = [1, 1]} : vector<4x256xf32> to vector<1x256xf32>
    %41 = vector.broadcast %39 : vector<4x1xf32> to vector<4x256xf32>
    %42 = vector.broadcast %40 : vector<1x256xf32> to vector<4x256xf32>
    %43 = arith.mulf %41, %42 : vector<4x256xf32>
    %44 = arith.addf %38, %43 : vector<4x256xf32>
    %45 = vector.extract_strided_slice %27 {offsets = [0, 3], sizes = [4, 1], strides = [1, 1]} : vector<4x4xf32> to vector<4x1xf32>
    %46 = vector.extract_strided_slice %1 {offsets = [3, 0], sizes = [1, 256], strides = [1, 1]} : vector<4x256xf32> to vector<1x256xf32>
    %47 = vector.broadcast %45 : vector<4x1xf32> to vector<4x256xf32>
    %48 = vector.broadcast %46 : vector<1x256xf32> to vector<4x256xf32>
    %49 = arith.mulf %47, %48 : vector<4x256xf32>
    %50 = arith.addf %44, %49 : vector<4x256xf32>
    %51 = arith.addf %26, %50 : vector<4x256xf32>
    %c0_9 = arith.constant 0 : index
    %c0_10 = arith.constant 0 : index
    %52 = vector.load %arg5[%c0_9, %c0_10] : memref<4x1xf32, #tpu.memory_space<vmem>>, vector<4x1xf32>
    %53 = vector.broadcast %52 : vector<4x1xf32> to vector<4x256xf32>
    %54 = arith.addf %51, %53 : vector<4x256xf32>
    %cst = arith.constant 0.000000e+00 : f32
    %55 = vector.broadcast %cst : f32 to vector<4x256xf32>
    %56 = arith.maximumf %54, %55 : vector<4x256xf32>
    %c0_11 = arith.constant 0 : index
    %c0_12 = arith.constant 0 : index
    %57 = vector.load %arg6[%c0_11, %c0_12] : memref<72x4xf32, #tpu.memory_space<vmem>>, vector<72x4xf32>
    %58 = vector.extract_strided_slice %57 {offsets = [0, 0], sizes = [72, 1], strides = [1, 1]} : vector<72x4xf32> to vector<72x1xf32>
    %59 = vector.extract_strided_slice %56 {offsets = [0, 0], sizes = [1, 256], strides = [1, 1]} : vector<4x256xf32> to vector<1x256xf32>
    %60 = vector.broadcast %58 : vector<72x1xf32> to vector<72x256xf32>
    %61 = vector.broadcast %59 : vector<1x256xf32> to vector<72x256xf32>
    %62 = arith.mulf %60, %61 : vector<72x256xf32>
    %63 = vector.extract_strided_slice %57 {offsets = [0, 1], sizes = [72, 1], strides = [1, 1]} : vector<72x4xf32> to vector<72x1xf32>
    %64 = vector.extract_strided_slice %56 {offsets = [1, 0], sizes = [1, 256], strides = [1, 1]} : vector<4x256xf32> to vector<1x256xf32>
    %65 = vector.broadcast %63 : vector<72x1xf32> to vector<72x256xf32>
    %66 = vector.broadcast %64 : vector<1x256xf32> to vector<72x256xf32>
    %67 = arith.mulf %65, %66 : vector<72x256xf32>
    %68 = arith.addf %62, %67 : vector<72x256xf32>
    %69 = vector.extract_strided_slice %57 {offsets = [0, 2], sizes = [72, 1], strides = [1, 1]} : vector<72x4xf32> to vector<72x1xf32>
    %70 = vector.extract_strided_slice %56 {offsets = [2, 0], sizes = [1, 256], strides = [1, 1]} : vector<4x256xf32> to vector<1x256xf32>
    %71 = vector.broadcast %69 : vector<72x1xf32> to vector<72x256xf32>
    %72 = vector.broadcast %70 : vector<1x256xf32> to vector<72x256xf32>
    %73 = arith.mulf %71, %72 : vector<72x256xf32>
    %74 = arith.addf %68, %73 : vector<72x256xf32>
    %75 = vector.extract_strided_slice %57 {offsets = [0, 3], sizes = [72, 1], strides = [1, 1]} : vector<72x4xf32> to vector<72x1xf32>
    %76 = vector.extract_strided_slice %56 {offsets = [3, 0], sizes = [1, 256], strides = [1, 1]} : vector<4x256xf32> to vector<1x256xf32>
    %77 = vector.broadcast %75 : vector<72x1xf32> to vector<72x256xf32>
    %78 = vector.broadcast %76 : vector<1x256xf32> to vector<72x256xf32>
    %79 = arith.mulf %77, %78 : vector<72x256xf32>
    %80 = arith.addf %74, %79 : vector<72x256xf32>
    %81 = vector.extract_strided_slice %80 {offsets = [32, 0], sizes = [8, 256], strides = [1, 1]} : vector<72x256xf32> to vector<8x256xf32>
    %82 = vector.extract_strided_slice %80 {offsets = [0, 0], sizes = [8, 256], strides = [1, 1]} : vector<72x256xf32> to vector<8x256xf32>
    %c17_i32 = arith.constant 17 : i32
    %83 = tpu.dynamic_rotate %82 by %c17_i32 dim 1 : vector<8x256xf32>, i32 -> vector<8x256xf32>
    %84 = vector.extract_strided_slice %2 {offsets = [0, 0], sizes = [1, 256], strides = [1, 1]} : vector<9x256xf32> to vector<1x256xf32>
    %85 = vector.broadcast %84 : vector<1x256xf32> to vector<8x256xf32>
    %86 = arith.mulf %83, %85 : vector<8x256xf32>
    %87 = arith.addf %81, %86 : vector<8x256xf32>
    %88 = vector.extract_strided_slice %80 {offsets = [8, 0], sizes = [8, 256], strides = [1, 1]} : vector<72x256xf32> to vector<8x256xf32>
    %c16_i32 = arith.constant 16 : i32
    %89 = tpu.dynamic_rotate %88 by %c16_i32 dim 1 : vector<8x256xf32>, i32 -> vector<8x256xf32>
    %90 = vector.extract_strided_slice %2 {offsets = [1, 0], sizes = [1, 256], strides = [1, 1]} : vector<9x256xf32> to vector<1x256xf32>
    %91 = vector.broadcast %90 : vector<1x256xf32> to vector<8x256xf32>
    %92 = arith.mulf %89, %91 : vector<8x256xf32>
    %93 = arith.addf %87, %92 : vector<8x256xf32>
    %94 = vector.extract_strided_slice %80 {offsets = [16, 0], sizes = [8, 256], strides = [1, 1]} : vector<72x256xf32> to vector<8x256xf32>
    %c15_i32 = arith.constant 15 : i32
    %95 = tpu.dynamic_rotate %94 by %c15_i32 dim 1 : vector<8x256xf32>, i32 -> vector<8x256xf32>
    %96 = vector.extract_strided_slice %2 {offsets = [2, 0], sizes = [1, 256], strides = [1, 1]} : vector<9x256xf32> to vector<1x256xf32>
    %97 = vector.broadcast %96 : vector<1x256xf32> to vector<8x256xf32>
    %98 = arith.mulf %95, %97 : vector<8x256xf32>
    %99 = arith.addf %93, %98 : vector<8x256xf32>
    %100 = vector.extract_strided_slice %80 {offsets = [24, 0], sizes = [8, 256], strides = [1, 1]} : vector<72x256xf32> to vector<8x256xf32>
    %c1_i32 = arith.constant 1 : i32
    %101 = tpu.dynamic_rotate %100 by %c1_i32 dim 1 : vector<8x256xf32>, i32 -> vector<8x256xf32>
    %102 = vector.extract_strided_slice %2 {offsets = [3, 0], sizes = [1, 256], strides = [1, 1]} : vector<9x256xf32> to vector<1x256xf32>
    %103 = vector.broadcast %102 : vector<1x256xf32> to vector<8x256xf32>
    %104 = arith.mulf %101, %103 : vector<8x256xf32>
    %105 = arith.addf %99, %104 : vector<8x256xf32>
    %106 = vector.extract_strided_slice %80 {offsets = [40, 0], sizes = [8, 256], strides = [1, 1]} : vector<72x256xf32> to vector<8x256xf32>
    %c255_i32 = arith.constant 255 : i32
    %107 = tpu.dynamic_rotate %106 by %c255_i32 dim 1 : vector<8x256xf32>, i32 -> vector<8x256xf32>
    %108 = vector.extract_strided_slice %2 {offsets = [5, 0], sizes = [1, 256], strides = [1, 1]} : vector<9x256xf32> to vector<1x256xf32>
    %109 = vector.broadcast %108 : vector<1x256xf32> to vector<8x256xf32>
    %110 = arith.mulf %107, %109 : vector<8x256xf32>
    %111 = arith.addf %105, %110 : vector<8x256xf32>
    %112 = vector.extract_strided_slice %80 {offsets = [48, 0], sizes = [8, 256], strides = [1, 1]} : vector<72x256xf32> to vector<8x256xf32>
    %c241_i32 = arith.constant 241 : i32
    %113 = tpu.dynamic_rotate %112 by %c241_i32 dim 1 : vector<8x256xf32>, i32 -> vector<8x256xf32>
    %114 = vector.extract_strided_slice %2 {offsets = [6, 0], sizes = [1, 256], strides = [1, 1]} : vector<9x256xf32> to vector<1x256xf32>
    %115 = vector.broadcast %114 : vector<1x256xf32> to vector<8x256xf32>
    %116 = arith.mulf %113, %115 : vector<8x256xf32>
    %117 = arith.addf %111, %116 : vector<8x256xf32>
    %118 = vector.extract_strided_slice %80 {offsets = [56, 0], sizes = [8, 256], strides = [1, 1]} : vector<72x256xf32> to vector<8x256xf32>
    %c240_i32 = arith.constant 240 : i32
    %119 = tpu.dynamic_rotate %118 by %c240_i32 dim 1 : vector<8x256xf32>, i32 -> vector<8x256xf32>
    %120 = vector.extract_strided_slice %2 {offsets = [7, 0], sizes = [1, 256], strides = [1, 1]} : vector<9x256xf32> to vector<1x256xf32>
    %121 = vector.broadcast %120 : vector<1x256xf32> to vector<8x256xf32>
    %122 = arith.mulf %119, %121 : vector<8x256xf32>
    %123 = arith.addf %117, %122 : vector<8x256xf32>
    %124 = vector.extract_strided_slice %80 {offsets = [64, 0], sizes = [8, 256], strides = [1, 1]} : vector<72x256xf32> to vector<8x256xf32>
    %c239_i32 = arith.constant 239 : i32
    %125 = tpu.dynamic_rotate %124 by %c239_i32 dim 1 : vector<8x256xf32>, i32 -> vector<8x256xf32>
    %126 = vector.extract_strided_slice %2 {offsets = [8, 0], sizes = [1, 256], strides = [1, 1]} : vector<9x256xf32> to vector<1x256xf32>
    %127 = vector.broadcast %126 : vector<1x256xf32> to vector<8x256xf32>
    %128 = arith.mulf %125, %127 : vector<8x256xf32>
    %129 = arith.addf %123, %128 : vector<8x256xf32>
    %c0_13 = arith.constant 0 : index
    %c0_14 = arith.constant 0 : index
    %130 = vector.load %arg7[%c0_13, %c0_14] : memref<8x1xf32, #tpu.memory_space<vmem>>, vector<8x1xf32>
    %131 = vector.broadcast %130 : vector<8x1xf32> to vector<8x256xf32>
    %132 = arith.addf %129, %131 : vector<8x256xf32>
    %cst_15 = arith.constant 0.000000e+00 : f32
    %133 = vector.broadcast %cst_15 : f32 to vector<8x256xf32>
    %134 = arith.maximumf %132, %133 : vector<8x256xf32>
    %c0_16 = arith.constant 0 : index
    %c0_17 = arith.constant 0 : index
    %135 = vector.load %arg8[%c0_16, %c0_17] : memref<9x8xf32, #tpu.memory_space<vmem>>, vector<9x8xf32>
    %136 = vector.extract_strided_slice %135 {offsets = [0, 0], sizes = [9, 1], strides = [1, 1]} : vector<9x8xf32> to vector<9x1xf32>
    %137 = vector.extract_strided_slice %134 {offsets = [0, 0], sizes = [1, 256], strides = [1, 1]} : vector<8x256xf32> to vector<1x256xf32>
    %138 = vector.broadcast %136 : vector<9x1xf32> to vector<9x256xf32>
    %139 = vector.broadcast %137 : vector<1x256xf32> to vector<9x256xf32>
    %140 = arith.mulf %138, %139 : vector<9x256xf32>
    %141 = vector.extract_strided_slice %135 {offsets = [0, 1], sizes = [9, 1], strides = [1, 1]} : vector<9x8xf32> to vector<9x1xf32>
    %142 = vector.extract_strided_slice %134 {offsets = [1, 0], sizes = [1, 256], strides = [1, 1]} : vector<8x256xf32> to vector<1x256xf32>
    %143 = vector.broadcast %141 : vector<9x1xf32> to vector<9x256xf32>
    %144 = vector.broadcast %142 : vector<1x256xf32> to vector<9x256xf32>
    %145 = arith.mulf %143, %144 : vector<9x256xf32>
    %146 = arith.addf %140, %145 : vector<9x256xf32>
    %147 = vector.extract_strided_slice %135 {offsets = [0, 2], sizes = [9, 1], strides = [1, 1]} : vector<9x8xf32> to vector<9x1xf32>
    %148 = vector.extract_strided_slice %134 {offsets = [2, 0], sizes = [1, 256], strides = [1, 1]} : vector<8x256xf32> to vector<1x256xf32>
    %149 = vector.broadcast %147 : vector<9x1xf32> to vector<9x256xf32>
    %150 = vector.broadcast %148 : vector<1x256xf32> to vector<9x256xf32>
    %151 = arith.mulf %149, %150 : vector<9x256xf32>
    %152 = arith.addf %146, %151 : vector<9x256xf32>
    %153 = vector.extract_strided_slice %135 {offsets = [0, 3], sizes = [9, 1], strides = [1, 1]} : vector<9x8xf32> to vector<9x1xf32>
    %154 = vector.extract_strided_slice %134 {offsets = [3, 0], sizes = [1, 256], strides = [1, 1]} : vector<8x256xf32> to vector<1x256xf32>
    %155 = vector.broadcast %153 : vector<9x1xf32> to vector<9x256xf32>
    %156 = vector.broadcast %154 : vector<1x256xf32> to vector<9x256xf32>
    %157 = arith.mulf %155, %156 : vector<9x256xf32>
    %158 = arith.addf %152, %157 : vector<9x256xf32>
    %159 = vector.extract_strided_slice %135 {offsets = [0, 4], sizes = [9, 1], strides = [1, 1]} : vector<9x8xf32> to vector<9x1xf32>
    %160 = vector.extract_strided_slice %134 {offsets = [4, 0], sizes = [1, 256], strides = [1, 1]} : vector<8x256xf32> to vector<1x256xf32>
    %161 = vector.broadcast %159 : vector<9x1xf32> to vector<9x256xf32>
    %162 = vector.broadcast %160 : vector<1x256xf32> to vector<9x256xf32>
    %163 = arith.mulf %161, %162 : vector<9x256xf32>
    %164 = arith.addf %158, %163 : vector<9x256xf32>
    %165 = vector.extract_strided_slice %135 {offsets = [0, 5], sizes = [9, 1], strides = [1, 1]} : vector<9x8xf32> to vector<9x1xf32>
    %166 = vector.extract_strided_slice %134 {offsets = [5, 0], sizes = [1, 256], strides = [1, 1]} : vector<8x256xf32> to vector<1x256xf32>
    %167 = vector.broadcast %165 : vector<9x1xf32> to vector<9x256xf32>
    %168 = vector.broadcast %166 : vector<1x256xf32> to vector<9x256xf32>
    %169 = arith.mulf %167, %168 : vector<9x256xf32>
    %170 = arith.addf %164, %169 : vector<9x256xf32>
    %171 = vector.extract_strided_slice %135 {offsets = [0, 6], sizes = [9, 1], strides = [1, 1]} : vector<9x8xf32> to vector<9x1xf32>
    %172 = vector.extract_strided_slice %134 {offsets = [6, 0], sizes = [1, 256], strides = [1, 1]} : vector<8x256xf32> to vector<1x256xf32>
    %173 = vector.broadcast %171 : vector<9x1xf32> to vector<9x256xf32>
    %174 = vector.broadcast %172 : vector<1x256xf32> to vector<9x256xf32>
    %175 = arith.mulf %173, %174 : vector<9x256xf32>
    %176 = arith.addf %170, %175 : vector<9x256xf32>
    %177 = vector.extract_strided_slice %135 {offsets = [0, 7], sizes = [9, 1], strides = [1, 1]} : vector<9x8xf32> to vector<9x1xf32>
    %178 = vector.extract_strided_slice %134 {offsets = [7, 0], sizes = [1, 256], strides = [1, 1]} : vector<8x256xf32> to vector<1x256xf32>
    %179 = vector.broadcast %177 : vector<9x1xf32> to vector<9x256xf32>
    %180 = vector.broadcast %178 : vector<1x256xf32> to vector<9x256xf32>
    %181 = arith.mulf %179, %180 : vector<9x256xf32>
    %182 = arith.addf %176, %181 : vector<9x256xf32>
    %183 = vector.extract_strided_slice %182 {offsets = [4, 0], sizes = [1, 256], strides = [1, 1]} : vector<9x256xf32> to vector<1x256xf32>
    %184 = vector.extract_strided_slice %182 {offsets = [0, 0], sizes = [1, 256], strides = [1, 1]} : vector<9x256xf32> to vector<1x256xf32>
    %c17_i32_18 = arith.constant 17 : i32
    %185 = tpu.dynamic_rotate %184 by %c17_i32_18 dim 1 : vector<1x256xf32>, i32 -> vector<1x256xf32>
    %186 = vector.extract_strided_slice %2 {offsets = [0, 0], sizes = [1, 256], strides = [1, 1]} : vector<9x256xf32> to vector<1x256xf32>
    %187 = arith.mulf %185, %186 : vector<1x256xf32>
    %188 = arith.addf %183, %187 : vector<1x256xf32>
    %189 = vector.extract_strided_slice %182 {offsets = [1, 0], sizes = [1, 256], strides = [1, 1]} : vector<9x256xf32> to vector<1x256xf32>
    %c16_i32_19 = arith.constant 16 : i32
    %190 = tpu.dynamic_rotate %189 by %c16_i32_19 dim 1 : vector<1x256xf32>, i32 -> vector<1x256xf32>
    %191 = vector.extract_strided_slice %2 {offsets = [1, 0], sizes = [1, 256], strides = [1, 1]} : vector<9x256xf32> to vector<1x256xf32>
    %192 = arith.mulf %190, %191 : vector<1x256xf32>
    %193 = arith.addf %188, %192 : vector<1x256xf32>
    %194 = vector.extract_strided_slice %182 {offsets = [2, 0], sizes = [1, 256], strides = [1, 1]} : vector<9x256xf32> to vector<1x256xf32>
    %c15_i32_20 = arith.constant 15 : i32
    %195 = tpu.dynamic_rotate %194 by %c15_i32_20 dim 1 : vector<1x256xf32>, i32 -> vector<1x256xf32>
    %196 = vector.extract_strided_slice %2 {offsets = [2, 0], sizes = [1, 256], strides = [1, 1]} : vector<9x256xf32> to vector<1x256xf32>
    %197 = arith.mulf %195, %196 : vector<1x256xf32>
    %198 = arith.addf %193, %197 : vector<1x256xf32>
    %199 = vector.extract_strided_slice %182 {offsets = [3, 0], sizes = [1, 256], strides = [1, 1]} : vector<9x256xf32> to vector<1x256xf32>
    %c1_i32_21 = arith.constant 1 : i32
    %200 = tpu.dynamic_rotate %199 by %c1_i32_21 dim 1 : vector<1x256xf32>, i32 -> vector<1x256xf32>
    %201 = vector.extract_strided_slice %2 {offsets = [3, 0], sizes = [1, 256], strides = [1, 1]} : vector<9x256xf32> to vector<1x256xf32>
    %202 = arith.mulf %200, %201 : vector<1x256xf32>
    %203 = arith.addf %198, %202 : vector<1x256xf32>
    %204 = vector.extract_strided_slice %182 {offsets = [5, 0], sizes = [1, 256], strides = [1, 1]} : vector<9x256xf32> to vector<1x256xf32>
    %c255_i32_22 = arith.constant 255 : i32
    %205 = tpu.dynamic_rotate %204 by %c255_i32_22 dim 1 : vector<1x256xf32>, i32 -> vector<1x256xf32>
    %206 = vector.extract_strided_slice %2 {offsets = [5, 0], sizes = [1, 256], strides = [1, 1]} : vector<9x256xf32> to vector<1x256xf32>
    %207 = arith.mulf %205, %206 : vector<1x256xf32>
    %208 = arith.addf %203, %207 : vector<1x256xf32>
    %209 = vector.extract_strided_slice %182 {offsets = [6, 0], sizes = [1, 256], strides = [1, 1]} : vector<9x256xf32> to vector<1x256xf32>
    %c241_i32_23 = arith.constant 241 : i32
    %210 = tpu.dynamic_rotate %209 by %c241_i32_23 dim 1 : vector<1x256xf32>, i32 -> vector<1x256xf32>
    %211 = vector.extract_strided_slice %2 {offsets = [6, 0], sizes = [1, 256], strides = [1, 1]} : vector<9x256xf32> to vector<1x256xf32>
    %212 = arith.mulf %210, %211 : vector<1x256xf32>
    %213 = arith.addf %208, %212 : vector<1x256xf32>
    %214 = vector.extract_strided_slice %182 {offsets = [7, 0], sizes = [1, 256], strides = [1, 1]} : vector<9x256xf32> to vector<1x256xf32>
    %c240_i32_24 = arith.constant 240 : i32
    %215 = tpu.dynamic_rotate %214 by %c240_i32_24 dim 1 : vector<1x256xf32>, i32 -> vector<1x256xf32>
    %216 = vector.extract_strided_slice %2 {offsets = [7, 0], sizes = [1, 256], strides = [1, 1]} : vector<9x256xf32> to vector<1x256xf32>
    %217 = arith.mulf %215, %216 : vector<1x256xf32>
    %218 = arith.addf %213, %217 : vector<1x256xf32>
    %219 = vector.extract_strided_slice %182 {offsets = [8, 0], sizes = [1, 256], strides = [1, 1]} : vector<9x256xf32> to vector<1x256xf32>
    %c239_i32_25 = arith.constant 239 : i32
    %220 = tpu.dynamic_rotate %219 by %c239_i32_25 dim 1 : vector<1x256xf32>, i32 -> vector<1x256xf32>
    %221 = vector.extract_strided_slice %2 {offsets = [8, 0], sizes = [1, 256], strides = [1, 1]} : vector<9x256xf32> to vector<1x256xf32>
    %222 = arith.mulf %220, %221 : vector<1x256xf32>
    %223 = arith.addf %218, %222 : vector<1x256xf32>
    %c0_26 = arith.constant 0 : index
    %c0_27 = arith.constant 0 : index
    %224 = vector.load %arg9[%c0_26, %c0_27] : memref<1x1xf32, #tpu.memory_space<vmem>>, vector<1x1xf32>
    %225 = vector.broadcast %224 : vector<1x1xf32> to vector<1x256xf32>
    %226 = arith.addf %223, %225 : vector<1x256xf32>
    %227 = arith.negf %226 : vector<1x256xf32>
    %228 = math.exp %227 : vector<1x256xf32>
    %cst_28 = arith.constant 1.000000e+00 : f32
    %229 = vector.broadcast %cst_28 : f32 to vector<1x256xf32>
    %230 = arith.addf %229, %228 : vector<1x256xf32>
    %231 = arith.divf %229, %230 : vector<1x256xf32>
    %232 = arith.subf %0, %1 : vector<4x256xf32>
    %233 = vector.broadcast %231 : vector<1x256xf32> to vector<4x256xf32>
    %234 = arith.mulf %233, %232 : vector<4x256xf32>
    %235 = arith.addf %1, %234 : vector<4x256xf32>
    %c0_29 = arith.constant 0 : index
    %c0_30 = arith.constant 0 : index
    %236 = vector.load %arg11[%c0_29, %c0_30] : memref<4x256xf32, #tpu.memory_space<vmem>>, vector<4x256xf32>
    tpu.vector_store %arg11[%c0_29, %c0_30], %235 {strides = array<i32>} : memref<4x256xf32, #tpu.memory_space<vmem>>, vector<4x256xf32>,
    return
  }
  func.func @transform_0(%arg0: i32) -> (i32, i32) {
    %c0_i32 = arith.constant 0 : i32
    %c0_i32_0 = arith.constant 0 : i32
    return %c0_i32, %arg0 : i32, i32
  }
  func.func @transform_1(%arg0: i32) -> (i32, i32) {
    %c0_i32 = arith.constant 0 : i32
    %c0_i32_0 = arith.constant 0 : i32
    return %c0_i32, %arg0 : i32, i32
  }
  func.func @transform_2(%arg0: i32) -> (i32, i32) {
    %c0_i32 = arith.constant 0 : i32
    %c0_i32_0 = arith.constant 0 : i32
    %c0_i32_1 = arith.constant 0 : i32
    return %c0_i32, %c0_i32_0 : i32, i32
  }
  func.func @transform_3(%arg0: i32) -> (i32, i32) {
    %c0_i32 = arith.constant 0 : i32
    %c0_i32_0 = arith.constant 0 : i32
    %c0_i32_1 = arith.constant 0 : i32
    return %c0_i32, %c0_i32_0 : i32, i32
  }
  func.func @transform_4(%arg0: i32) -> (i32, i32) {
    %c0_i32 = arith.constant 0 : i32
    %c0_i32_0 = arith.constant 0 : i32
    %c0_i32_1 = arith.constant 0 : i32
    return %c0_i32, %c0_i32_0 : i32, i32
  }
  func.func @transform_5(%arg0: i32) -> (i32, i32) {
    %c0_i32 = arith.constant 0 : i32
    %c0_i32_0 = arith.constant 0 : i32
    %c0_i32_1 = arith.constant 0 : i32
    return %c0_i32, %c0_i32_0 : i32, i32
  }
  func.func @transform_6(%arg0: i32) -> (i32, i32) {
    %c0_i32 = arith.constant 0 : i32
    %c0_i32_0 = arith.constant 0 : i32
    %c0_i32_1 = arith.constant 0 : i32
    return %c0_i32, %c0_i32_0 : i32, i32
  }
  func.func @transform_7(%arg0: i32) -> (i32, i32) {
    %c0_i32 = arith.constant 0 : i32
    %c0_i32_0 = arith.constant 0 : i32
    %c0_i32_1 = arith.constant 0 : i32
    return %c0_i32, %c0_i32_0 : i32, i32
  }
  func.func @transform_8(%arg0: i32) -> (i32, i32) {
    %c0_i32 = arith.constant 0 : i32
    %c0_i32_0 = arith.constant 0 : i32
    %c0_i32_1 = arith.constant 0 : i32
    return %c0_i32, %c0_i32_0 : i32, i32
  }
  func.func @transform_9(%arg0: i32) -> (i32, i32) {
    %c0_i32 = arith.constant 0 : i32
    %c0_i32_0 = arith.constant 0 : i32
    %c0_i32_1 = arith.constant 0 : i32
    return %c0_i32, %c0_i32_0 : i32, i32
  }
  func.func @transform_10(%arg0: i32) -> (i32, i32) {
    %c0_i32 = arith.constant 0 : i32
    %c0_i32_0 = arith.constant 0 : i32
    return %c0_i32, %arg0 : i32, i32
  }
}

</mosaic_0001>

<bundles_post_ra>
// kernel: tpu_custom_call.1
= control target key start
LH: loop header
LB: loop body
LE: loop exit
PB: predicated region body
PF: predicated region fallthrough
CT: control target
= control target key end

     0   :  { %s2523_s0 = inlined_call_operand.vmem [shape: f32[4,512], index: 0, kind: input, shape index: {}]   ;;  %s2524_s1 = inlined_call_operand.vmem [shape: f32[4,512], index: 1, kind: input, shape index: {}]   ;;  %s2525_s2 = inlined_call_operand.vmem [shape: f32[4,4], index: 2, kind: input, shape index: {}]   ;;  %s2526_s3 = inlined_call_operand.vmem [shape: f32[4,4], index: 3, kind: input, shape index: {}]   ;;  %s2527_s4 = inlined_call_operand.vmem [shape: f32[4,1], index: 4, kind: input, shape index: {}]   ;;  %s2528_s5 = inlined_call_operand.vmem [shape: f32[72,4], index: 5, kind: input, shape index: {}]   ;;  %s2529_s6 = inlined_call_operand.vmem [shape: f32[8,1], index: 6, kind: input, shape index: {}]   ;;  %s2530_s7 = inlined_call_operand.vmem [shape: f32[9,8], index: 7, kind: input, shape index: {}]   ;;  %s2531_s8 = inlined_call_operand.<no memory space> [shape: f32[1,1], index: 8, kind: input, shape index: {}]   ;;  %s2532_s9 = inlined_call_operand.vmem [shape: f32[9,256], index: 9, kind: input, shape index: {}]   ;;  %s2533_s10 = inlined_call_operand.hbm [shape: f32[4,512], index: 10, kind: output, shape index: {}]  }
   0x1   :  { %v15_v0 = vstv %s2531_s8 }
   0x2   :  { %16 = vst [vmem:[#allocation2] sm:$0x1] %v15_v0 }
   0x3   :  { %17 = vsyncpa [#allocation4], 0 }
   0x4   :  { %19 = vsyncpa [#allocation4 + $0x1], 0  ;;  %s1872_s15 = smov 0   ;;  %s1874_s16 = smov 0  }
   0x5   :  { %s1876_s17 = smov 0   ;;  %s1878_s18 = smov 0  }
   0x6 LB: > { %s1893_s8 = sadd.s32 4294967295, %s1795_s18   ;;  %s1599_s19 = sadd.s32 4294967294, %s1795_s18   ;;  %s1795_s18 = sphi %s1878_s18, %s2545_s18   ;;  %s1791_s17 = sphi %s1876_s17, %s2544_s17   ;;  %s1787_s16 = sphi %s1874_s16, %s2543_s16   ;;  %s1783_s15 = sphi %s1872_s15, %s2542_s15  }
   0x7   : > { %s1897_s20 = sadd.s32 1, %s1795_s18   ;;  %s252_s21 = sadd.s32 1, %s1791_s17 }
   0x8   : > { %s249_s22 = ssub.s32 %s1795_s18, %s1897_s20  ;;  %p262_p0 = scmp.ne.s32.totalorder %s1791_s17, %s1787_s16 }
   0x9   : > { %p250_p1 = scmp.eq.s32.totalorder %s249_s22, 0  ;;  %p263_p2 = scmp.eq.s32.totalorder %s1893_s8, 1 }
   0xa   : > { %p268_p3 = scmp.ne.s32.totalorder %s1787_s16, %s1783_s15  ;;  %p269_p4 = scmp.eq.s32.totalorder %s1599_s19, 1 }
   0xb   : > { %s1908_s23 = scalar_select %p250_p1, %s1791_s17, %s252_s21  }
   0xc   : > { %p1910_p5 = por %p263_p2, %p262_p0  ;;  %p1914_p6 = por %p269_p4, %p268_p3 }
   0xd   : > { %p1602_p7 = scmp.ge.s32.totalorder %s1795_s18, 1  ;;  %p329_p8 = scmp.lt.s32.totalorder %s1795_s18, 3 }
   0xf   : > { %p330_p9 = pnand %p1602_p7, %p329_p8 }
  0x10   : > { %v496_v1 = vld [vmem:[%s2526_s3] sm:$0xf] (!%p330_p9)  ;;  %v1797_v3 = vmov (!%p330_p9), 2   ;;  %v614_v4 = vld [vmem:[%s2528_s5 + $0x8] sm:$0xff] (!%p330_p9)  ;;  %v1798_v5 = vmov (!%p330_p9), 3   ;;  %v1799_v6 = vmov (!%p330_p9), 0   ;;  %v398_v19 = vlaneseq (!%p330_p9) }
  0x11   : > { %333 = sbr.rel (%p330_p9) target bundleno = 629 (0x275), region = 60  ;;  %v391_v2 = vld [vmem:[%s2525_s2] sm:$0xf] (!%p330_p9)  ;;  %1674 = vset.pattern.permute.xlu0 (!%p330_p9), %v1797_v3  ;;  %1671 = vset.pattern.permute.xlu1 (!%p330_p9), %v1797_v3  ;;  %v1800_v7 = vmov (!%p330_p9), 1   ;;  %v1938_v8 = vld [vmem:[%s2528_s5 + $0x30] sm:$0xff] (!%p330_p9)  ;;  %v616_v11 = vld [vmem:[%s2528_s5 + $0x18] sm:$0xff] (!%p330_p9) }
  0x12   : > { %550 = vperm.xlu0 (!%p330_p9), %1674, %v496_v1   ;;  %445 = vperm.xlu1 (!%p330_p9), %1671, %v391_v2   ;;  %v603_v9 = vld [vmem:[%s2527_s4] sm:$0xf] (!%p330_p9)  ;;  %v620_v12 = vld [vmem:[%s2528_s5 + $0x38] sm:$0xff] (!%p330_p9)  ;;  %v615_v13 = vld [vmem:[%s2528_s5 + $0x10] sm:$0xff] (!%p330_p9)  ;;  %s1604_s30 = sshll.u32 (!%p330_p9), %s1893_s8, 1  ;;  %v399_v22 = vshrl.u32 (!%p330_p9), %v398_v19, 7 }
  0x13   : > { %v613_v10 = vld [vmem:[%s2528_s5] sm:$0xff] (!%p330_p9)  ;;  %v618_v14 = vld [vmem:[%s2528_s5 + $0x28] sm:$0xff] (!%p330_p9)  ;;  %p373_p10 = scmp.lt.s32.totalorder (!%p330_p9), %s1604_s30, 3  ;;  %s1801_s26 = smov (!%p330_p9), 17  }
  0x14   : > { %v1974_v15 = vld [vmem:[%s2528_s5 + $0x20] sm:$0xff] (!%p330_p9)  ;;  %v2020_v23 = vsub.s32 (!%p330_p9), 1, %v399_v22  ;;  %v2022_v24 = vsub.s32 (!%p330_p9), 5, %v399_v22  ;;  %v2025_v25 = vsub.s32 (!%p330_p9), 0, %v399_v22  ;;  %v2027_v26 = vsub.s32 (!%p330_p9), 4, %v399_v22  ;;  %s1802_s27 = smov (!%p330_p9), 16  }
  0x15   : > { %v1087_v16 = vld [vmem:[%s2529_s6] sm:$0xff] (!%p330_p9)  ;;  %v2040_v32 = vsub.s32 (!%p330_p9), 2, %v399_v22  ;;  %v2042_v33 = vsub.s32 (!%p330_p9), 6, %v399_v22  ;;  %v2055_v45 = vsub.s32 (!%p330_p9), 3, %v399_v22  ;;  %v2057_v46 = vsub.s32 (!%p330_p9), 7, %v399_v22  ;;  %s1803_s28 = smov (!%p330_p9), 15  }
  0x16   : > { %1683 = vset.pattern.permute.xlu0 (!%p330_p9), %v1798_v5  ;;  %1672 = vset.pattern.permute.xlu1 (!%p330_p9), %v1799_v6  ;;  %v1987_v17 = vld [vmem:[%s2530_s7] sm:$0xff] (!%p330_p9)  ;;  %s1804_s29 = smov (!%p330_p9), 1   ;;  %s2536_s12 = smov (!%p330_p9), 112  }
  0x17   : > { %858 = vperm.xlu0 (!%p330_p9), %1683, %v614_v4   ;;  %499 = vperm.xlu1 (!%p330_p9), %1672, %v496_v1   ;;  %v621_v18 = vld [vmem:[%s2528_s5 + $0x40] sm:$0xff] (!%p330_p9)  ;;  %s2534_s13 = smov (!%p330_p9), 111  }
  0x18   : > { %s2547_s30 = smov (!%p373_p10, %s1604_s30), 3 }
  0x19   : > { %s1605_s11 = sshll.u32 %s2547_s30, 2  ;;  %s1805_s30 = smov 127  }
  0x1a   : > { %s2018_s14 = scalar_lea.vmem %s2524_s1, %s1605_s11  ;;  %s2034_s22 = scalar_lea.vmem %s2523_s0, %s1605_s11 }
  0x1b   : > { %1684 = vset.pattern.permute.xlu0 %v1800_v7  ;;  %1673 = vset.pattern.permute.xlu1 %v1800_v7  ;;  %v386_v29 = vld [vmem:[%s2018_s14] sm:$0xff]  ;;  %s1806_s11 = smov 113  }
  0x1c   : > { %419 = vperm.xlu0 %1684, %v391_v2   ;;  %524 = vperm.xlu1 %1673, %v496_v1   ;;  %v530_v30 = vrot.slane %v386_v29, %v2020_v23  ;;  %v534_v31 = vrot.slane %v386_v29, %v2022_v24  ;;  %v385_v34 = vld [vmem:[%s2034_s22] sm:$0xff]  ;;  %v506_v35 = vrot.slane %v386_v29, %v2025_v25 }
  0x1d   : > { %v510_v36 = vrot.slane %v386_v29, %v2027_v26  ;;  %v425_v39 = vrot.slane %v385_v34, %v2020_v23  ;;  %v429_v40 = vrot.slane %v385_v34, %v2022_v24  ;;  %v556_v41 = vrot.slane %v386_v29, %v2040_v32 }
  0x1e   : > { %v560_v42 = vrot.slane %v386_v29, %v2042_v33  ;;  %v540_v43 = vrot.slane %v530_v30, %v2020_v23  ;;  %v544_v44 = vrot.slane %v534_v31, %v2020_v23  ;;  %v401_v47 = vrot.slane %v385_v34, %v2025_v25 }
  0x1f   : > { %v405_v48 = vrot.slane %v385_v34, %v2027_v26  ;;  %v451_v49 = vrot.slane %v385_v34, %v2040_v32  ;;  %v455_v50 = vrot.slane %v385_v34, %v2042_v33  ;;  %v516_v51 = vrot.slane %v506_v35, %v2025_v25 }
  0x20   : > { %718 = vperm.xlu0 %1684, %v1938_v8   ;;  %1675 = vset.pattern.permute.xlu1 %v1798_v5  ;;  %v520_v52 = vrot.slane %v510_v36, %v2025_v25  ;;  %v435_v53 = vrot.slane %v425_v39, %v2020_v23  ;;  %v439_v54 = vrot.slane %v429_v40, %v2020_v23 }
  0x21   : > { %471 = vperm.xlu1 %1675, %v391_v2   ;;  %v582_v56 = vrot.slane %v386_v29, %v2055_v45  ;;  %v586_v57 = vrot.slane %v386_v29, %v2057_v46  ;;  %v566_v58 = vrot.slane %v556_v41, %v2040_v32  ;;  %v570_v59 = vrot.slane %v560_v42, %v2040_v32 }
  0x22   : > { %v477_v63 = vrot.slane %v385_v34, %v2055_v45  ;;  %v481_v0 = vrot.slane %v385_v34, %v2057_v46 }
  0x24   : > { %1689 = vset.pattern.permute.xlu0 %v1799_v6  ;;  %v487_v31 = vrot.slane %v477_v63, %v2055_v45  ;;  %v491_v34 = vrot.slane %v481_v0, %v2055_v45 }
  0x25   : > { %394 = vperm.xlu0 %1689, %v391_v2   ;;  %576 = vperm.xlu1 %1675, %v496_v1   ;;  %v411_v1 = vrot.slane %v401_v47, %v2025_v25  ;;  %v415_v2 = vrot.slane %v405_v48, %v2025_v25 }
  0x29   : > { %606 = vperm.xlu0 %1689, %v603_v9   ;;  %1676 = vset.pattern.permute.xlu1 %v1799_v6 }
  0x2a   : > { %624 = vperm.xlu1 %1676, %v613_v10  }
  0x2d   : > { %629 = vperm.xlu0 %1689, %v614_v4  }
  0x2e   : > { %1677 = vset.pattern.permute.xlu1 %v1800_v7 }
  0x2f   : > { %694 = vperm.xlu1 %1677, %v613_v10  }
  0x31   : > { %639 = vperm.xlu0 %1689, %v616_v11  }
  0x33   : > { %698 = vperm.xlu1 %1677, %v614_v4  }
  0x35   : > { %659 = vperm.xlu0 %1689, %v620_v12  }
  0x37   : > { %1678 = vset.pattern.permute.xlu1 %v1799_v6 }
  0x38   : > { %634 = vperm.xlu1 %1678, %v615_v13  }
  0x39   : > { %1692 = vset.pattern.permute.xlu0 %v1797_v3 }
  0x3a   : > { %774 = vperm.xlu0 %1692, %v613_v10  }
  0x3c   : > { %1679 = vset.pattern.permute.xlu1 %v1800_v7 }
  0x3d   : > { %702 = vperm.xlu1 %1679, %v615_v13  }
  0x3e   : > { %778 = vperm.xlu0 %1692, %v614_v4   ;;  %v461_v4 = vrot.slane %v451_v49, %v2040_v32 }
  0x41   : > { %1680 = vset.pattern.permute.xlu1 %v1798_v5 }
  0x42   : > { %786 = vperm.xlu0 %1692, %v616_v11   ;;  %854 = vperm.xlu1 %1680, %v613_v10  }
  0x46   : > { %802 = vperm.xlu0 %1692, %v620_v12   ;;  %1681 = vset.pattern.permute.xlu1 %v1800_v7 }
  0x47   : > { %706 = vperm.xlu1 %1681, %v616_v11  }
  0x4a   : > { %1697 = vset.pattern.permute.xlu0 %v1798_v5 }
  0x4b   : > { %874 = vperm.xlu0 %1697, %v618_v14   ;;  %1682 = vset.pattern.permute.xlu1 %v1797_v3 }
  0x4c   : > { %782 = vperm.xlu1 %1682, %v615_v13  }
  0x4f   : > { %882 = vperm.xlu0 %1697, %v620_v12  }
  0x50   : > { %1685 = vset.pattern.permute.xlu1 %v1799_v6 }
  0x51   : > { %649 = vperm.xlu1 %1685, %v618_v14  }
  0x53   : > { %1702 = vset.pattern.permute.xlu0 %v1800_v7 }
  0x54   : > { %710 = vperm.xlu0 %1702, %v1974_v15  }
  0x55   : > { %1686 = vset.pattern.permute.xlu1 %v1800_v7 }
  0x56   : > { %714 = vperm.xlu1 %1686, %v618_v14  }
  0x58   : > { %1705 = vset.pattern.permute.xlu0 %v1799_v6 }
  0x59   : > { %1090 = vperm.xlu0 %1705, %v1087_v16  }
  0x5a   : > { %1687 = vset.pattern.permute.xlu1 %v1798_v5 }
  0x5b   : > { %862 = vperm.xlu1 %1687, %v615_v13   ;;  %v592_v13 = vrot.slane %v582_v56, %v2055_v45 }
  0x5d   : > { %1101 = vperm.xlu0 %1705, %v1987_v17  }
  0x5f   : > { %1688 = vset.pattern.permute.xlu1 %v1799_v6 }
  0x60   : > { %654 = vperm.xlu1 %1688, %v1938_v8  }
  0x61   : > { %1707 = vset.pattern.permute.xlu0 %v1797_v3 }
  0x64   : > { %1690 = vset.pattern.permute.xlu1 %v1797_v3 }
  0x65   : > { %794 = vperm.xlu1 %1690, %v618_v14   ;;  %v596_v14 = vrot.slane %v586_v57, %v2055_v45 }
  0x69   : > { %1691 = vset.pattern.permute.xlu1 %v1798_v5 }
  0x6a   : > { %866 = vperm.xlu1 %1691, %v616_v11  }
  0x6e   : > { %1693 = vset.pattern.permute.xlu1 %v1800_v7 }
  0x6f   : > { %722 = vperm.xlu1 %1693, %v620_v12  }
  0x73   : > { %1694 = vset.pattern.permute.xlu1 %v1797_v3 }
  0x74   : > { %798 = vperm.xlu1 %1694, %v1938_v8  }
  0x78   : > { %1695 = vset.pattern.permute.xlu1 %v1799_v6 }
  0x79   : > { %664 = vperm.xlu1 %1695, %v621_v18  }
  0x7d   : > { %1696 = vset.pattern.permute.xlu1 %v1800_v7 }
  0x7e   : > { %726 = vperm.xlu1 %1696, %v621_v18  }
  0x82   : > { %1698 = vset.pattern.permute.xlu1 %v1798_v5 }
  0x83   : > { %878 = vperm.xlu1 %1698, %v1938_v8   ;;  %v465_v8 = vrot.slane %v455_v50, %v2040_v32 }
  0x87   : > { %1699 = vset.pattern.permute.xlu1 %v1797_v3 }
  0x88   : > { %806 = vperm.xlu1 %1699, %v621_v18  }
  0x8c   : > { %1700 = vset.pattern.permute.xlu1 %v1798_v5 }
  0x8d   : > { %886 = vperm.xlu1 %1700, %v621_v18  }
  0x91   : > { %1701 = vset.pattern.permute.xlu1 %v1799_v6  ;;  %v2009_v20 = vpop.permute.xlu1 %445  ;;  %v2011_v21 = vpop.permute.xlu0 %550 }
  0x92   : > { %644 = vperm.xlu1 %1701, %v1974_v15   ;;  %v572_v16 = vmul.f32 %v570_v59, %v2011_v21  ;;  %v466_v36 = vmul.f32 %v461_v4, %v2009_v20 }
  0x96   : > { %1703 = vset.pattern.permute.xlu1 %v1797_v3  ;;  %v500_v27 = vpop.permute.xlu1 %499  ;;  %v2029_v28 = vpop.permute.xlu0 %858 }
  0x97   : > { %790 = vperm.xlu1 %1703, %v1974_v15   ;;  %v521_v9 = vmul.f32 %v516_v51, %v500_v27  ;;  %v522_v10 = vmul.f32 %v520_v52, %v500_v27 }
  0x9b   : > { %1704 = vset.pattern.permute.xlu1 %v1798_v5  ;;  %v525_v37 = vpop.permute.xlu1 %524  ;;  %v420_v38 = vpop.permute.xlu0 %419 }
  0x9c   : > { %870 = vperm.xlu1 %1704, %v1974_v15   ;;  %v545_v60 = vmul.f32 %v540_v43, %v525_v37  ;;  %v546_v61 = vmul.f32 %v544_v44, %v525_v37  ;;  %v440_v11 = vmul.f32 %v435_v53, %v420_v38  ;;  %v441_v12 = vmul.f32 %v439_v54, %v420_v38 }
  0x9d   : > { %v571_v15 = vmul.f32 %v566_v58, %v2011_v21  ;;  %v467_v37 = vmul.f32 %v465_v8, %v2009_v20 }
  0x9e   : > { %v547_v18 = vadd.f32 %v545_v60, %v521_v9  ;;  %v548_v22 = vadd.f32 %v546_v61, %v522_v10 }
  0x9f   : > { %v2067_v55 = vpop.permute.xlu0 %718 }
  0xa0   : > { %v472_v62 = vpop.permute.xlu1 %471  ;;  %1706 = vset.pattern.permute.xlu1 %v1800_v7  ;;  %v573_v41 = vadd.f32 %v571_v15, %v547_v18  ;;  %v574_v42 = vadd.f32 %v572_v16, %v548_v22 }
  0xa1   : > { %1122 = vperm.xlu1 %1706, %v1987_v17   ;;  %v492_v44 = vmul.f32 %v487_v31, %v472_v62  ;;  %v493_v47 = vmul.f32 %v491_v34, %v472_v62 }
  0xa4   : > { %v395_v29 = vpop.permute.xlu0 %394  ;;  %v577_v30 = vpop.permute.xlu1 %576 }
  0xa5   : > { %v416_v35 = vmul.f32 %v411_v1, %v395_v29  ;;  %v417_v27 = vmul.f32 %v415_v2, %v395_v29  ;;  %1708 = vset.pattern.permute.xlu1 %v1798_v5  ;;  %v597_v40 = vmul.f32 %v592_v13, %v577_v30  ;;  %v598_v21 = vmul.f32 %v596_v14, %v577_v30 }
  0xa7   : > { %v442_v38 = vadd.f32 %v440_v11, %v416_v35  ;;  %v443_v39 = vadd.f32 %v441_v12, %v417_v27  ;;  %v599_v51 = vadd.f32 %v597_v40, %v573_v41  ;;  %v600_v52 = vadd.f32 %v598_v21, %v574_v42 }
  0xa8   : > { %v607_v43 = vpop.permute.xlu0 %606 }
  0xa9   : > { %v468_v48 = vadd.f32 %v466_v36, %v442_v38  ;;  %v469_v49 = vadd.f32 %v467_v37, %v443_v39  ;;  %v625_v50 = vpop.permute.xlu1 %624 }
  0xab   : > { %v494_v53 = vadd.f32 %v492_v44, %v468_v48  ;;  %v495_v54 = vadd.f32 %v493_v47, %v469_v49 }
  0xac   : > { %v630_v56 = vpop.permute.xlu0 %629 }
  0xad   : > { %v601_v57 = vadd.f32 %v599_v51, %v494_v53  ;;  %v602_v58 = vadd.f32 %v600_v52, %v495_v54 }
  0xae   : > { %v695_v20 = vpop.permute.xlu1 %694 }
  0xaf   : > { %v609_v59 = vadd.f32 %v607_v43, %v601_v57  ;;  %v610_v60 = vadd.f32 %v607_v43, %v602_v58 }
  0xb0   : > { %v2090_v61 = vpop.permute.xlu0 %639 }
  0xb1   : > { %v611_v0 = vmax.f32 %v609_v59, 0.0  ;;  %v612_v1 = vmax.f32 %v610_v60, 0.0 }
  0xb2   : > { %v699_v63 = vpop.permute.xlu1 %698 }
  0xb3   : > { %v2095_v4 = vrot.slane %v611_v0, %v2025_v25  ;;  %v2098_v8 = vrot.slane %v612_v1, %v2025_v25  ;;  %v2101_v9 = vrot.slane %v611_v0, %v2020_v23  ;;  %v2104_v10 = vrot.slane %v612_v1, %v2020_v23 }
  0xb4   : > { %v2092_v2 = vpop.permute.xlu0 %659  ;;  %v2107_v12 = vrot.slane %v611_v0, %v2040_v32  ;;  %v2110_v13 = vrot.slane %v612_v1, %v2040_v32  ;;  %v2123_v37 = vrot.slane %v611_v0, %v2055_v45  ;;  %v2126_v38 = vrot.slane %v612_v1, %v2055_v45 }
  0xb5   : > { %v675_v14 = vmul.f32 %v2095_v4, %v625_v50  ;;  %v676_v15 = vmul.f32 %v2098_v8, %v625_v50  ;;  %v737_v16 = vmul.f32 %v2101_v9, %v695_v20  ;;  %v738_v18 = vmul.f32 %v2104_v10, %v695_v20 }
  0xb6   : > { %v677_v29 = vmul.f32 %v2095_v4, %v630_v56  ;;  %v678_v30 = vmul.f32 %v2098_v8, %v630_v56  ;;  %v739_v31 = vmul.f32 %v2101_v9, %v699_v63  ;;  %v740_v34 = vmul.f32 %v2104_v10, %v699_v63 }
  0xb7   : > { %v635_v62 = vpop.permute.xlu1 %634  ;;  %v755_v39 = vadd.f32 %v737_v16, %v675_v14  ;;  %v756_v40 = vadd.f32 %v738_v18, %v676_v15  ;;  %v900_v57 = vmul.f32 %v2126_v38, %v2029_v28  ;;  %v899_v58 = vmul.f32 %v2123_v37, %v2029_v28 }
  0xb8   : > { %v757_v42 = vadd.f32 %v739_v31, %v677_v29  ;;  %v758_v43 = vadd.f32 %v740_v34, %v678_v30  ;;  %v679_v14 = vmul.f32 %v2095_v4, %v635_v62  ;;  %v680_v15 = vmul.f32 %v2098_v8, %v635_v62 }
  0xb9   : > { %v775_v11 = vpop.permute.xlu0 %774 }
  0xba   : > { %v817_v27 = vmul.f32 %v2107_v12, %v775_v11  ;;  %v818_v36 = vmul.f32 %v2110_v13, %v775_v11 }
  0xbc   : > { %v703_v22 = vpop.permute.xlu1 %702  ;;  %v835_v47 = vadd.f32 %v817_v27, %v755_v39  ;;  %v836_v48 = vadd.f32 %v818_v36, %v756_v40 }
  0xbd   : > { %v779_v35 = vpop.permute.xlu0 %778  ;;  %v741_v0 = vmul.f32 %v2101_v9, %v703_v22  ;;  %v742_v1 = vmul.f32 %v2104_v10, %v703_v22 }
  0xbe   : > { %v819_v21 = vmul.f32 %v2107_v12, %v779_v35  ;;  %v820_v41 = vmul.f32 %v2110_v13, %v779_v35 }
  0xbf   : > { %v759_v18 = vadd.f32 %v741_v0, %v679_v14  ;;  %v760_v29 = vadd.f32 %v742_v1, %v680_v15 }
  0xc0   : > { %v837_v51 = vadd.f32 %v819_v21, %v757_v42  ;;  %v838_v52 = vadd.f32 %v820_v41, %v758_v43  ;;  %v681_v41 = vmul.f32 %v2095_v4, %v2090_v61  ;;  %v682_v42 = vmul.f32 %v2098_v8, %v2090_v61 }
  0xc1   : > { %v855_v44 = vpop.permute.xlu1 %854  ;;  %v787_v39 = vpop.permute.xlu0 %786 }
  0xc2   : > { %v897_v49 = vmul.f32 %v2123_v37, %v855_v44  ;;  %v898_v50 = vmul.f32 %v2126_v38, %v855_v44  ;;  %v918_v20 = vadd.f32 %v900_v57, %v838_v52  ;;  %v917_v59 = vadd.f32 %v899_v58, %v837_v51 }
  0xc3   : > { %v823_v51 = vmul.f32 %v2107_v12, %v787_v39  ;;  %v824_v52 = vmul.f32 %v2110_v13, %v787_v39 }
  0xc4   : > { %v915_v53 = vadd.f32 %v897_v49, %v835_v47  ;;  %v916_v54 = vadd.f32 %v898_v50, %v836_v48 }
  0xc5   : > { %v803_v44 = vpop.permute.xlu0 %802 }
  0xc6   : > { %v707_v56 = vpop.permute.xlu1 %706  ;;  %935 = vrot.lane.b32.xlu1 %v916_v54, %s1801_s26  ;;  %933 = vrot.lane.b32.xlu0 %v915_v53, %s1801_s26 }
  0xc7   : > { %v743_v62 = vmul.f32 %v2101_v9, %v707_v56  ;;  %v744_v21 = vmul.f32 %v2104_v10, %v707_v56 }
  0xc9   : > { %v761_v47 = vadd.f32 %v743_v62, %v681_v41  ;;  %v762_v48 = vadd.f32 %v744_v21, %v682_v42  ;;  %v689_v21 = vmul.f32 %v2095_v4, %v2092_v2  ;;  %v690_v41 = vmul.f32 %v2098_v8, %v2092_v2 }
  0xca   : > { %956 = vrot.lane.b32.xlu1 %v918_v20, %s1802_s27  ;;  %954 = vrot.lane.b32.xlu0 %v917_v59, %s1802_s27  ;;  %v749_v42 = vmul.f32 %v2101_v9, %v2067_v55 }
  0xcb   : > { %v783_v60 = vpop.permute.xlu1 %782  ;;  %v841_v58 = vadd.f32 %v823_v51, %v761_v47  ;;  %v842_v20 = vadd.f32 %v824_v52, %v762_v48  ;;  %v831_v52 = vmul.f32 %v2107_v12, %v803_v44 }
  0xcc   : > { %v821_v28 = vmul.f32 %v2107_v12, %v783_v60  ;;  %v822_v16 = vmul.f32 %v2110_v13, %v783_v60 }
  0xce   : > { %v839_v31 = vadd.f32 %v821_v28, %v759_v18  ;;  %v840_v34 = vadd.f32 %v822_v16, %v760_v29 }
  0xd0   : > { %v650_v63 = vpop.permute.xlu1 %649 }
  0xd1   : > { %v685_v53 = vmul.f32 %v2095_v4, %v650_v63  ;;  %v686_v54 = vmul.f32 %v2098_v8, %v650_v63 }
  0xd5   : > { %v715_v11 = vpop.permute.xlu1 %714 }
  0xd6   : > { %v747_v49 = vmul.f32 %v2101_v9, %v715_v11  ;;  %v748_v50 = vmul.f32 %v2104_v10, %v715_v11  ;;  %v875_v11 = vpop.permute.xlu0 %874 }
  0xd7   : > { %v907_v63 = vmul.f32 %v2123_v37, %v875_v11  ;;  %v908_v18 = vmul.f32 %v2126_v38, %v875_v11 }
  0xd8   : > { %v765_v59 = vadd.f32 %v747_v49, %v685_v53  ;;  %v766_v60 = vadd.f32 %v748_v50, %v686_v54  ;;  %v832_v53 = vmul.f32 %v2110_v13, %v803_v44 }
  0xda   : > { %v863_v30 = vpop.permute.xlu1 %862 }
  0xdb   : > { %v901_v35 = vmul.f32 %v2123_v37, %v863_v30  ;;  %v902_v27 = vmul.f32 %v2126_v38, %v863_v30 }
  0xdd   : > { %v919_v36 = vadd.f32 %v901_v35, %v839_v31  ;;  %v920_v22 = vadd.f32 %v902_v27, %v840_v34 }
  0xdf   : > { %v655_v40 = vpop.permute.xlu1 %654  ;;  %975 = vrot.lane.b32.xlu1 %v920_v22, %s1803_s28  ;;  %973 = vrot.lane.b32.xlu0 %v919_v36, %s1803_s28 }
  0xe0   : > { %v687_v27 = vmul.f32 %v2095_v4, %v655_v40  ;;  %v688_v36 = vmul.f32 %v2098_v8, %v655_v40 }
  0xe2   : > { %v767_v48 = vadd.f32 %v749_v42, %v687_v27  ;;  %v1810_v42 = vmov 4  }
  0xe4   : > { %v795_v43 = vpop.permute.xlu1 %794 }
  0xe5   : > { %v827_v56 = vmul.f32 %v2107_v12, %v795_v43  ;;  %v828_v61 = vmul.f32 %v2110_v13, %v795_v43  ;;  %v750_v43 = vmul.f32 %v2104_v10, %v2067_v55  ;;  %v883_v55 = vpop.permute.xlu0 %882 }
  0xe7   : > { %v845_v14 = vadd.f32 %v827_v56, %v765_v59  ;;  %v846_v15 = vadd.f32 %v828_v61, %v766_v60  ;;  %v768_v49 = vadd.f32 %v750_v43, %v688_v36  ;;  %v1811_v43 = vmov 6  }
  0xe9   : > { %v867_v57 = vpop.permute.xlu1 %866  ;;  %v926_v30 = vadd.f32 %v908_v18, %v846_v15  ;;  %v925_v31 = vadd.f32 %v907_v63, %v845_v14 }
  0xea   : > { %v903_v0 = vmul.f32 %v2123_v37, %v867_v57  ;;  %v904_v1 = vmul.f32 %v2126_v38, %v867_v57 }
  0xec   : > { %v921_v28 = vadd.f32 %v903_v0, %v841_v58  ;;  %v922_v16 = vadd.f32 %v904_v1, %v842_v20  ;;  %v911_v0 = vmul.f32 %v2123_v37, %v883_v55  ;;  %v912_v1 = vmul.f32 %v2126_v38, %v883_v55 }
  0xee   : > { %v723_v29 = vpop.permute.xlu1 %722  ;;  %994 = vrot.lane.b32.xlu1 %v922_v16, %s1804_s29  ;;  %992 = vrot.lane.b32.xlu0 %v921_v28, %s1804_s29 }
  0xef   : > { %v751_v22 = vmul.f32 %v2101_v9, %v723_v29  ;;  %v752_v39 = vmul.f32 %v2104_v10, %v723_v29 }
  0xf1   : > { %v769_v50 = vadd.f32 %v751_v22, %v689_v21  ;;  %v770_v51 = vadd.f32 %v752_v39, %v690_v41  ;;  %v1809_v41 = vmov 5  }
  0xf2   : > { %1013 = vrot.lane.b32.xlu1 %v926_v30, %s1805_s30  ;;  %1011 = vrot.lane.b32.xlu0 %v925_v31, %s1805_s30 }
  0xf3   : > { %v799_v34 = vpop.permute.xlu1 %798  ;;  %v849_v58 = vadd.f32 %v831_v52, %v769_v50  ;;  %v850_v20 = vadd.f32 %v832_v53, %v770_v51 }
  0xf4   : > { %v829_v47 = vmul.f32 %v2107_v12, %v799_v34  ;;  %v830_v40 = vmul.f32 %v2110_v13, %v799_v34 }
  0xf5   : > { %v930_v28 = vadd.f32 %v912_v1, %v850_v20  ;;  %v929_v16 = vadd.f32 %v911_v0, %v849_v58 }
  0xf6   : > { %v847_v2 = vadd.f32 %v829_v47, %v767_v48  ;;  %v848_v56 = vadd.f32 %v830_v40, %v768_v49  ;;  %v1812_v47 = vmov 7   ;;  %v711_v48 = vpop.permute.xlu0 %710 }
  0xf8   : > { %v665_v35 = vpop.permute.xlu1 %664 }
  0xf9   : > { %v691_v44 = vmul.f32 %v2095_v4, %v665_v35  ;;  %v692_v30 = vmul.f32 %v2098_v8, %v665_v35  ;;  %v1098_v35 = vld [vmem:[%s2530_s7 + $0x8] sm:$0x1] }
  0xfd   : > { %v727_v62 = vpop.permute.xlu1 %726 }
  0xfe   : > { %v753_v11 = vmul.f32 %v2101_v9, %v727_v62  ;;  %v754_v63 = vmul.f32 %v2104_v10, %v727_v62 }
 0x100   : > { %v771_v18 = vadd.f32 %v753_v11, %v691_v44  ;;  %v772_v36 = vadd.f32 %v754_v63, %v692_v30  ;;  %v745_v44 = vmul.f32 %v2101_v9, %v711_v48 }
 0x102   : > { %v879_v54 = vpop.permute.xlu1 %878 }
 0x103   : > { %v909_v61 = vmul.f32 %v2123_v37, %v879_v54  ;;  %v910_v57 = vmul.f32 %v2126_v38, %v879_v54 }
 0x105   : > { %v927_v59 = vadd.f32 %v909_v61, %v847_v2  ;;  %v928_v60 = vadd.f32 %v910_v57, %v848_v56  ;;  %v2235_v61 = vld [vmem:[%s2532_s9 + $0x8] sm:$0xff]  ;;  %v2238_v57 = vand.u32 127, %v398_v19 }
 0x106   : > { %v968_v19 = vrot.slane %v2235_v61, %v2020_v23 }
 0x107   : > { %v807_v14 = vpop.permute.xlu1 %806  ;;  %1032 = vrot.lane.b32.xlu1 %v928_v60, %s1806_s11  ;;  %1030 = vrot.lane.b32.xlu0 %v927_v59, %s1806_s11  ;;  %v949_v59 = vrot.slane %v2235_v61, %v2025_v25  ;;  %vm939_vm0 = vcmp.lt.s32.totalorder %v2238_v57, 17  ;;  %vm958_vm1 = vcmp.lt.s32.totalorder %v2238_v57, 16  ;;  %vm977_vm2 = vcmp.lt.s32.totalorder %v2238_v57, 15 }
 0x108   : > { %v833_v15 = vmul.f32 %v2107_v12, %v807_v14  ;;  %v834_v31 = vmul.f32 %v2110_v13, %v807_v14  ;;  %v987_v14 = vrot.slane %v2235_v61, %v2040_v32  ;;  %vm996_vm3 = vcmp.lt.s32.totalorder %v2238_v57, 1 }
 0x109   : > { %vm1015_vm4 = vcmp.lt.s32.totalorder %v2238_v57, 127  ;;  %vm1034_vm5 = vcmp.lt.s32.totalorder %v2238_v57, 113  ;;  %vm1053_vm6 = vcmp.lt.s32.totalorder %v2238_v57, 112  ;;  %vm1072_vm7 = vcmp.lt.s32.totalorder %v2238_v57, 111 }
 0x10a   : > { %v851_v34 = vadd.f32 %v833_v15, %v771_v18  ;;  %v852_v62 = vadd.f32 %v834_v31, %v772_v36 }
 0x10b   : > { %1051 = vrot.lane.b32.xlu1 %v930_v28, %s2536_s12  ;;  %1049 = vrot.lane.b32.xlu0 %v929_v16, %s2536_s12 }
 0x10c   : > { %v887_v29 = vpop.permute.xlu1 %886 }
 0x10d   : > { %v913_v27 = vmul.f32 %v2123_v37, %v887_v29  ;;  %v914_v22 = vmul.f32 %v2126_v38, %v887_v29 }
 0x10f   : > { %v931_v39 = vadd.f32 %v913_v27, %v851_v34  ;;  %1146 = vperm.xlu0 %1707, %v1987_v17   ;;  %v932_v21 = vadd.f32 %v914_v22, %v852_v62  ;;  %v1006_v34 = vrot.slane %v2235_v61, %v2055_v45 }
 0x111   : > { %1068 = vrot.lane.b32.xlu1 %v931_v39, %s2534_s13  ;;  %v645_v40 = vpop.permute.xlu1 %644 }
 0x112   : > { %v683_v0 = vmul.f32 %v2095_v4, %v645_v40  ;;  %v684_v1 = vmul.f32 %v2098_v8, %v645_v40  ;;  %v746_v4 = vmul.f32 %v2104_v10, %v711_v48 }
 0x113   : > { %1710 = vset.pattern.permute.xlu0 %v1809_v41 }
 0x114   : > { %1218 = vperm.xlu0 %1710, %v1987_v17   ;;  %v763_v9 = vadd.f32 %v745_v44, %v683_v0  ;;  %v764_v30 = vadd.f32 %v746_v4, %v684_v1 }
 0x115   : > { %1070 = vrot.lane.b32.xlu1 %v932_v21, %s2534_s13 }
 0x116   : > { %v791_v49 = vpop.permute.xlu1 %790 }
 0x117   : > { %v825_v8 = vmul.f32 %v2107_v12, %v791_v49  ;;  %v826_v15 = vmul.f32 %v2110_v13, %v791_v49 }
 0x118   : > { %1713 = vset.pattern.permute.xlu0 %v1799_v6 }
 0x119   : > { %1170 = vperm.xlu1 %1708, %v1987_v17   ;;  %1106 = vperm.xlu0 %1713, %v1098_v35   ;;  %v843_v27 = vadd.f32 %v825_v8, %v763_v9  ;;  %v844_v36 = vadd.f32 %v826_v15, %v764_v30 }
 0x11d   : > { %1709 = vset.pattern.permute.xlu1 %v1810_v42  ;;  %1716 = vset.pattern.permute.xlu0 %v1798_v5  ;;  %v1469_v5 = vld [vmem:[#allocation2] sm:$0x1] }
 0x11e   : > { %1194 = vperm.xlu1 %1709, %v1987_v17   ;;  %1174 = vperm.xlu0 %1716, %v1098_v35  }
 0x122   : > { %1711 = vset.pattern.permute.xlu1 %v1811_v43  ;;  %1719 = vset.pattern.permute.xlu0 %v1811_v43 }
 0x123   : > { %1242 = vperm.xlu1 %1711, %v1987_v17   ;;  %1246 = vperm.xlu0 %1719, %v1098_v35  }
 0x127   : > { %1712 = vset.pattern.permute.xlu1 %v1812_v47  ;;  %1722 = vset.pattern.permute.xlu0 %v1799_v6 }
 0x128   : > { %1266 = vperm.xlu1 %1712, %v1987_v17   ;;  %v2221_v17 = vpop.permute.xlu0 %1090 }
 0x12c   : > { %1714 = vset.pattern.permute.xlu1 %v1800_v7  ;;  %v871_v7 = vpop.permute.xlu1 %870  ;;  %v2223_v50 = vpop.permute.xlu0 %1101 }
 0x12d   : > { %1126 = vperm.xlu1 %1714, %v1098_v35   ;;  %v905_v10 = vmul.f32 %v2123_v37, %v871_v7  ;;  %v906_v12 = vmul.f32 %v2126_v38, %v871_v7 }
 0x12f   : > { %v924_v43 = vadd.f32 %v906_v12, %v844_v36 }
 0x131   : > { %1715 = vset.pattern.permute.xlu1 %v1797_v3  ;;  %v2225_v3 = vpop.permute.xlu1 %1122 }
 0x132   : > { %1150 = vperm.xlu1 %1715, %v1098_v35  }
 0x136   : > { %1717 = vset.pattern.permute.xlu1 %v1810_v42  ;;  %v923_v42 = vadd.f32 %v905_v10, %v843_v27 }
 0x137   : > { %1198 = vperm.xlu1 %1717, %v1098_v35  }
 0x138   : > { %v936_v51 = vpop.permute.xlu1 %935  ;;  %v934_v52 = vpop.permute.xlu0 %933 }
 0x139   : > { %v940_v63 = vsel %vm939_vm0, %v934_v52, %v936_v51  ;;  %v941_v18 = vsel %vm939_vm0, %v936_v51, %v934_v52 }
 0x13a   : > { %v951_v39 = vmul.f32 %v949_v59, %v940_v63 }
 0x13b   : > { %1718 = vset.pattern.permute.xlu1 %v1809_v41 }
 0x13c   : > { %1222 = vperm.xlu1 %1718, %v1098_v35   ;;  %v957_v53 = vpop.permute.xlu1 %956  ;;  %v955_v54 = vpop.permute.xlu0 %954  ;;  %v953_v51 = vadd.f32 %v951_v39, %v924_v43 }
 0x13d   : > { %v959_v13 = vsel %vm958_vm1, %v955_v54, %v957_v53  ;;  %v960_v31 = vsel %vm958_vm1, %v957_v53, %v955_v54 }
 0x140   : > { %1720 = vset.pattern.permute.xlu1 %v1812_v47 }
 0x141   : > { %1270 = vperm.xlu1 %1720, %v1098_v35   ;;  %v1025_v35 = vrot.slane %v2235_v61, %v2022_v24 }
 0x145   : > { %1721 = vset.pattern.permute.xlu1 %v1799_v6  ;;  %v2230_v6 = vld [vmem:[%s2532_s9] sm:$0xff] }
 0x146   : > { %1472 = vperm.xlu1 %1721, %v1469_v5   ;;  %v945_v20 = vrot.slane %v2230_v6, %v2025_v25  ;;  %v964_v60 = vrot.slane %v2230_v6, %v2020_v23  ;;  %v983_v11 = vrot.slane %v2230_v6, %v2040_v32  ;;  %v1002_v29 = vrot.slane %v2230_v6, %v2055_v45 }
 0x147   : > { %v1021_v41 = vrot.slane %v2230_v6, %v2022_v24  ;;  %v970_v5 = vmul.f32 %v968_v19, %v959_v13  ;;  %v1040_v49 = vrot.slane %v2230_v6, %v2042_v33 }
 0x148   : > { %v950_v22 = vmul.f32 %v945_v20, %v941_v18  ;;  %v969_v47 = vmul.f32 %v964_v60, %v960_v31 }
 0x14a   : > { %v952_v7 = vadd.f32 %v950_v22, %v923_v42 }
 0x151   : > { %v976_v2 = vpop.permute.xlu1 %975  ;;  %v974_v56 = vpop.permute.xlu0 %973 }
 0x152   : > { %v978_v37 = vsel %vm977_vm2, %v974_v56, %v976_v2  ;;  %v979_v38 = vsel %vm977_vm2, %v976_v2, %v974_v56  ;;  %v1044_v56 = vrot.slane %v2235_v61, %v2042_v33 }
 0x153   : > { %v988_v52 = vmul.f32 %v983_v11, %v979_v38  ;;  %v989_v53 = vmul.f32 %v987_v14, %v978_v37  ;;  %v1059_v11 = vrot.slane %v2230_v6, %v2057_v46  ;;  %v1063_v14 = vrot.slane %v2235_v61, %v2057_v46 }
 0x160   : > { %v995_v55 = vpop.permute.xlu1 %994  ;;  %v993_v58 = vpop.permute.xlu0 %992 }
 0x161   : > { %v997_v40 = vsel %vm996_vm3, %v993_v58, %v995_v55  ;;  %v998_v48 = vsel %vm996_vm3, %v995_v55, %v993_v58  ;;  %v971_v55 = vadd.f32 %v969_v47, %v952_v7  ;;  %v972_v58 = vadd.f32 %v970_v5, %v953_v51 }
 0x162   : > { %v1007_v20 = vmul.f32 %v1002_v29, %v998_v48  ;;  %v1008_v59 = vmul.f32 %v1006_v34, %v997_v40 }
 0x163   : > { %v990_v44 = vadd.f32 %v988_v52, %v971_v55  ;;  %v991_v4 = vadd.f32 %v989_v53, %v972_v58 }
 0x164   : > { %v1014_v28 = vpop.permute.xlu1 %1013  ;;  %v1012_v16 = vpop.permute.xlu0 %1011 }
 0x165   : > { %v1016_v54 = vsel %vm1015_vm4, %v1012_v16, %v1014_v28  ;;  %v1017_v2 = vsel %vm1015_vm4, %v1014_v28, %v1012_v16  ;;  %v2310_v28 = vld [vmem:[%s2532_s9 + $0x10] sm:$0x1]  ;;  %v2315_v16 = vld [vmem:[%s2532_s9 + $0x18] sm:$0x1]  ;;  %v1009_v29 = vadd.f32 %v1007_v20, %v990_v44  ;;  %v1010_v9 = vadd.f32 %v1008_v59, %v991_v4 }
 0x166   : > { %v1026_v8 = vmul.f32 %v1021_v41, %v1016_v54  ;;  %v1027_v15 = vmul.f32 %v1025_v35, %v1017_v2  ;;  %v1078_v13 = vrot.slane %v2310_v28, %v2025_v25  ;;  %v1082_v31 = vrot.slane %v2315_v16, %v2025_v25 }
 0x168   : > { %v1028_v34 = vadd.f32 %v1026_v8, %v1009_v29  ;;  %v1029_v27 = vadd.f32 %v1027_v15, %v1010_v9 }
 0x179   : > { %v1033_v62 = vpop.permute.xlu1 %1032  ;;  %v1031_v21 = vpop.permute.xlu0 %1030 }
 0x17a   : > { %v1035_v1 = vsel %vm1034_vm5, %v1031_v21, %v1033_v62  ;;  %v1036_v19 = vsel %vm1034_vm5, %v1033_v62, %v1031_v21 }
 0x17b   : > { %v1045_v30 = vmul.f32 %v1040_v49, %v1035_v1  ;;  %v1046_v10 = vmul.f32 %v1044_v56, %v1036_v19 }
 0x17d   : > { %v1052_v60 = vpop.permute.xlu1 %1051  ;;  %v1050_v0 = vpop.permute.xlu0 %1049  ;;  %v1047_v39 = vadd.f32 %v1045_v30, %v1028_v34  ;;  %v1048_v62 = vadd.f32 %v1046_v10, %v1029_v27 }
 0x17e   : > { %v1054_v63 = vsel %vm1053_vm6, %v1050_v0, %v1052_v60  ;;  %v1055_v18 = vsel %vm1053_vm6, %v1052_v60, %v1050_v0 }
 0x17f   : > { %v1064_v36 = vmul.f32 %v1059_v11, %v1054_v63  ;;  %v1065_v22 = vmul.f32 %v1063_v14, %v1055_v18 }
 0x181   : > { %v1066_v41 = vadd.f32 %v1064_v36, %v1047_v39  ;;  %v1067_v35 = vadd.f32 %v1065_v22, %v1048_v62 }
 0x183   : > { %v1069_v12 = vpop.permute.xlu1 %1068 }
 0x187   : > { %v1071_v21 = vpop.permute.xlu1 %1070 }
 0x188   : > { %v1073_v37 = vsel %vm1072_vm7, %v1069_v12, %v1071_v21  ;;  %v1074_v38 = vsel %vm1072_vm7, %v1071_v21, %v1069_v12 }
 0x189   : > { %v1083_v42 = vmul.f32 %v1078_v13, %v1073_v37  ;;  %v1084_v43 = vmul.f32 %v1082_v31, %v1074_v38 }
 0x18b   : > { %v1085_v47 = vadd.f32 %v1083_v42, %v1066_v41  ;;  %v1086_v5 = vadd.f32 %v1084_v43, %v1067_v35 }
 0x18d   : > { %v1093_v40 = vadd.f32 %v2221_v17, %v1085_v47  ;;  %v1094_v48 = vadd.f32 %v2221_v17, %v1086_v5 }
 0x18e   : > { %v1147_v19 = vpop.permute.xlu0 %1146 }
 0x18f   : > { %v1095_v49 = vmax.f32 %v1093_v40, 0.0  ;;  %v1096_v7 = vmax.f32 %v1094_v48, 0.0 }
 0x191   : > { %v1112_v51 = vrot.slane %v1095_v49, %v2025_v25  ;;  %v1116_v52 = vrot.slane %v1096_v7, %v2025_v25  ;;  %v1132_v53 = vrot.slane %v1095_v49, %v2020_v23  ;;  %v1136_v54 = vrot.slane %v1096_v7, %v2020_v23 }
 0x192   : > { %v1156_v17 = vrot.slane %v1095_v49, %v2040_v32  ;;  %v1160_v20 = vrot.slane %v1096_v7, %v2040_v32  ;;  %v2343_v1 = vrot.slane %v1095_v49, %v2055_v45  ;;  %v2346_v23 = vrot.slane %v1096_v7, %v2055_v45 }
 0x193   : > { %v1117_v2 = vmul.f32 %v1112_v51, %v2223_v50  ;;  %v1118_v56 = vmul.f32 %v1116_v52, %v2223_v50  ;;  %v1137_v55 = vmul.f32 %v1132_v53, %v2225_v3  ;;  %v1138_v58 = vmul.f32 %v1136_v54, %v2225_v3  ;;  %v1219_v10 = vpop.permute.xlu0 %1218 }
 0x194   : > { %v1161_v11 = vmul.f32 %v1156_v17, %v1147_v19  ;;  %v1162_v50 = vmul.f32 %v1160_v20, %v1147_v19  ;;  %v1204_v32 = vrot.slane %v1095_v49, %v2027_v26  ;;  %v1208_v8 = vrot.slane %v1096_v7, %v2027_v26 }
 0x195   : > { %v1141_v59 = vadd.f32 %v1137_v55, %v1117_v2  ;;  %v1142_v60 = vadd.f32 %v1138_v58, %v1118_v56  ;;  %v2353_v15 = vrot.slane %v1095_v49, %v2022_v24  ;;  %v2356_v63 = vrot.slane %v1096_v7, %v2022_v24 }
 0x196   : > { %v2361_v36 = vrot.slane %v1095_v49, %v2042_v33  ;;  %v2364_v22 = vrot.slane %v1096_v7, %v2042_v33  ;;  %v2369_v37 = vrot.slane %v1095_v49, %v2057_v46  ;;  %v2372_v38 = vrot.slane %v1096_v7, %v2057_v46 }
 0x197   : > { %v1165_v44 = vadd.f32 %v1161_v11, %v1141_v59  ;;  %v1166_v4 = vadd.f32 %v1162_v50, %v1142_v60  ;;  %v1233_v31 = vmul.f32 %v2353_v15, %v1219_v10  ;;  %v1234_v34 = vmul.f32 %v2356_v63, %v1219_v10 }
 0x198   : > { %v1171_v0 = vpop.permute.xlu1 %1170  ;;  %v1107_v40 = vpop.permute.xlu0 %1106 }
 0x199   : > { %v1185_v14 = vmul.f32 %v2343_v1, %v1171_v0  ;;  %v1186_v3 = vmul.f32 %v2346_v23, %v1171_v0  ;;  %v1119_v56 = vmul.f32 %v1112_v51, %v1107_v40  ;;  %v1120_v55 = vmul.f32 %v1116_v52, %v1107_v40 }
 0x19b   : > { %v1189_v18 = vadd.f32 %v1185_v14, %v1165_v44  ;;  %v1190_v29 = vadd.f32 %v1186_v3, %v1166_v4 }
 0x19d   : > { %v1195_v45 = vpop.permute.xlu1 %1194  ;;  %v1175_v0 = vpop.permute.xlu0 %1174 }
 0x19e   : > { %v1209_v9 = vmul.f32 %v1204_v32, %v1195_v45  ;;  %v1210_v30 = vmul.f32 %v1208_v8, %v1195_v45  ;;  %v1187_v51 = vmul.f32 %v2343_v1, %v1175_v0  ;;  %v1188_v52 = vmul.f32 %v2346_v23, %v1175_v0 }
 0x19f   : > { %v1344_v0 = vrot.slane %v2235_v61, 2 }
 0x1a0   : > { %v1213_v12 = vadd.f32 %v1209_v9, %v1189_v18  ;;  %v1214_v13 = vadd.f32 %v1210_v30, %v1190_v29 }
 0x1a2   : > { %v1243_v27 = vpop.permute.xlu1 %1242  ;;  %v1237_v24 = vadd.f32 %v1233_v31, %v1213_v12  ;;  %v1238_v39 = vadd.f32 %v1234_v34, %v1214_v13 }
 0x1a3   : > { %v1257_v62 = vmul.f32 %v2361_v36, %v1243_v27  ;;  %v1258_v21 = vmul.f32 %v2364_v22, %v1243_v27 }
 0x1a5   : > { %v1261_v35 = vadd.f32 %v1257_v62, %v1237_v24  ;;  %v1262_v42 = vadd.f32 %v1258_v21, %v1238_v39 }
 0x1a7   : > { %v1267_v41 = vpop.permute.xlu1 %1266 }
 0x1a8   : > { %v1281_v43 = vmul.f32 %v2369_v37, %v1267_v41  ;;  %v1282_v33 = vmul.f32 %v2372_v38, %v1267_v41 }
 0x1aa   : > { %v2376_v47 = vadd.f32 %v1281_v43, %v1261_v35  ;;  %v2378_v5 = vadd.f32 %v1282_v33, %v1262_v42 }
 0x1ac   : > { %v1127_v48 = vpop.permute.xlu1 %1126  ;;  %1291 = vrot.lane.b32.xlu0 %v2378_v5, %s1801_s26  ;;  %1289 = vrot.lane.b32.xlu1 %v2376_v47, %s1801_s26  ;;  %v1308_v7 = vrot.slane %v2378_v5, 1  ;;  %v1307_v2 = vrot.slane %v2376_v47, 1  ;;  %v1334_v59 = vrot.slane %v2378_v5, 2  ;;  %v1333_v60 = vrot.slane %v2376_v47, 2  ;;  %s2540_s26 = smov 112  }
 0x1ad   : > { %v1139_v46 = vmul.f32 %v1132_v53, %v1127_v48  ;;  %v1140_v49 = vmul.f32 %v1136_v54, %v1127_v48  ;;  %v1358_v44 = vrot.slane %v2378_v5, 3  ;;  %v1357_v4 = vrot.slane %v2376_v47, 3 }
 0x1ae   : > { %v1381_v9 = vrot.slane %v2376_v47, 5  ;;  %v1406_v31 = vrot.slane %v2378_v5, 6  ;;  %v1405_v34 = vrot.slane %v2376_v47, 6 }
 0x1af   : > { %v1143_v19 = vadd.f32 %v1139_v46, %v1119_v56  ;;  %v1144_v11 = vadd.f32 %v1140_v49, %v1120_v55  ;;  %v1319_v46 = vrot.slane %v2230_v6, 1  ;;  %v1320_v49 = vrot.slane %v2235_v61, 1 }
 0x1b0   : > { %1313 = vrot.lane.b32.xlu0 %v1308_v7, %s1802_s27  ;;  %1311 = vrot.lane.b32.xlu1 %v1307_v2, %s1802_s27  ;;  %s2541_s27 = smov 111  }
 0x1b1   : > { %v1151_v58 = vpop.permute.xlu1 %1150 }
 0x1b2   : > { %v1163_v53 = vmul.f32 %v1156_v17, %v1151_v58  ;;  %v1164_v54 = vmul.f32 %v1160_v20, %v1151_v58  ;;  %v1382_v20 = vrot.slane %v2378_v5, 5 }
 0x1b4   : > { %v1167_v50 = vadd.f32 %v1163_v53, %v1143_v19  ;;  %v1168_v14 = vadd.f32 %v1164_v54, %v1144_v11  ;;  %1339 = vrot.lane.b32.xlu0 %v1334_v59, %s1803_s28  ;;  %1337 = vrot.lane.b32.xlu1 %v1333_v60, %s1803_s28  ;;  %v1343_v60 = vrot.slane %v2230_v6, 2  ;;  %s369_s28 = sand.u32 1, %s1787_s16  }
 0x1b5   : > { %s1514_s19 = scalar_lea.sflag [#allocation4], %s369_s28 }
 0x1b6   : > { %v1199_v3 = vpop.permute.xlu1 %1198  ;;  %v1191_v45 = vadd.f32 %v1187_v51, %v1167_v50  ;;  %v1192_v29 = vadd.f32 %v1188_v52, %v1168_v14  ;;  %v1367_v51 = vrot.slane %v2230_v6, 3  ;;  %v1368_v52 = vrot.slane %v2235_v61, 3 }
 0x1b7   : > { %v1211_v18 = vmul.f32 %v1204_v32, %v1199_v3  ;;  %v1212_v17 = vmul.f32 %v1208_v8, %v1199_v3  ;;  %v1247_v32 = vpop.permute.xlu0 %1246 }
 0x1b8   : > { %1363 = vrot.lane.b32.xlu0 %v1358_v44, %s1804_s29  ;;  %1361 = vrot.lane.b32.xlu1 %v1357_v4, %s1804_s29  ;;  %v1259_v27 = vmul.f32 %v2361_v36, %v1247_v32  ;;  %v1260_v24 = vmul.f32 %v2364_v22, %v1247_v32  ;;  %s1603_s29 = sshll.u32 %s369_s28, 3 }
 0x1b9   : > { %v1215_v1 = vadd.f32 %v1211_v18, %v1191_v45  ;;  %v1216_v23 = vadd.f32 %v1212_v17, %v1192_v29 }
 0x1bb   : > { %v1223_v30 = vpop.permute.xlu1 %1222 }
 0x1bc   : > { %v1235_v10 = vmul.f32 %v2353_v15, %v1223_v30  ;;  %v1236_v12 = vmul.f32 %v2356_v63, %v1223_v30  ;;  %1387 = vrot.lane.b32.xlu0 %v1382_v20, %s1805_s30  ;;  %1385 = vrot.lane.b32.xlu1 %v1381_v9, %s1805_s30  ;;  %v1430_v15 = vrot.slane %v2378_v5, 7  ;;  %v1429_v63 = vrot.slane %v2376_v47, 7  ;;  %s1615_s30 = sshll.u32 %s1893_s8, 7  ;;  %s1813_s8 = smov [#allocation3]  }
 0x1bd   : > { %v1392_v30 = vrot.slane %v2235_v61, 5 }
 0x1be   : > { %v1239_v8 = vadd.f32 %v1235_v10, %v1215_v1  ;;  %v1240_v13 = vadd.f32 %v1236_v12, %v1216_v23  ;;  %v1391_v1 = vrot.slane %v2230_v6, 5 }
 0x1c0   : > { %v1271_v39 = vpop.permute.xlu1 %1270  ;;  %1411 = vrot.lane.b32.xlu0 %v1406_v31, %s1806_s11  ;;  %1409 = vrot.lane.b32.xlu1 %v1405_v34, %s1806_s11  ;;  %v1263_v62 = vadd.f32 %v1259_v27, %v1239_v8  ;;  %v1264_v21 = vadd.f32 %v1260_v24, %v1240_v13  ;;  %v1415_v34 = vrot.slane %v2230_v6, 6  ;;  %v1416_v27 = vrot.slane %v2235_v61, 6  ;;  %s371_s11 = scalar_lea.vmem [#allocation3], %s1603_s29 }
 0x1c1   : > { %v1283_v41 = vmul.f32 %v2369_v37, %v1271_v39  ;;  %v1284_v35 = vmul.f32 %v2372_v38, %v1271_v39  ;;  %s1528_s12 = sshll.u32 %s371_s11, 4  ;;  %s2483_s12 = int_to_ptr.vmem [resolvable:$true] %s1528_s12 }
 0x1c2   : > { %s1733_s21 = scalar_lea.vmem %s2483_s12, 128 }
 0x1c3   : > { %v1287_v36 = vadd.f32 %v1283_v41, %v1263_v62  ;;  %v1288_v22 = vadd.f32 %v1284_v35, %v1264_v21  ;;  %p1734_p11 = scmp.ne.s32.totalorder %s2483_s12, %s1733_s21 }
 0x1c4   : > { %1435 = vrot.lane.b32.xlu0 %v1430_v15, %s2540_s26  ;;  %1433 = vrot.lane.b32.xlu1 %v1429_v63, %s2540_s26  ;;  %s1737_s26 = sshll.u32 %s1813_s8, 4  ;;  %s1738_s26 = int_to_ptr.vmem [resolvable:$false] %s1737_s26 }
 0x1c5   : > { %v2418_v42 = vpop.permute.xlu1 %1472  ;;  %p1735_p12 = pnand %p1734_p11, %p1910_p5  ;;  %p1740_p0 = scmp.lt.s32.totalorder %s2483_s12, %s1738_s26 }
 0x1c7   : > { %p1736_p13 = pneg %p1735_p12 }
 0x1c8   : > { %1455 = vrot.lane.b32.xlu1 %v1288_v22, %s2541_s27  ;;  %1453 = vrot.lane.b32.xlu0 %v1287_v36, %s2541_s27  ;;  %s1739_s27 = scalar_lea.vmem %s1738_s26, 256 }
 0x1c9   : > { %p1741_p1 = scmp.lt.s32.totalorder %s1739_s27, %s1733_s21 }
 0x1cb   : > { %p1742_p2 = por %p1741_p1, %p1740_p0 }
 0x1cd   : > { %p1743_p3 = pnand %p1742_p2, %p1736_p13 }
 0x21e   : > { %v1290_v43 = vpop.permute.xlu1 %1289  ;;  %v1292_v33 = vpop.permute.xlu0 %1291 }
 0x21f   : > { %v1293_v37 = vsel %vm939_vm0, %v1290_v43, %v1292_v33  ;;  %v1294_v38 = vsel %vm939_vm0, %v1292_v33, %v1290_v43 }
 0x220   : > { %v1295_v58 = vmul.f32 %v1294_v38, %v2230_v6  ;;  %v1296_v59 = vmul.f32 %v1293_v37, %v2235_v61 }
 0x222   : > { %v1312_v40 = vpop.permute.xlu1 %1311  ;;  %v1314_v48 = vpop.permute.xlu0 %1313  ;;  %v1299_v3 = vrot.slane %v1295_v58, 4  ;;  %v1300_v44 = vrot.slane %v1296_v59, 4 }
 0x223   : > { %v1315_v56 = vsel %vm958_vm1, %v1312_v40, %v1314_v48  ;;  %v1316_v55 = vsel %vm958_vm1, %v1314_v48, %v1312_v40  ;;  %v1439_v40 = vrot.slane %v2230_v6, 7  ;;  %v1440_v48 = vrot.slane %v2235_v61, 7 }
 0x224   : > { %v1323_v19 = vmul.f32 %v1319_v46, %v1316_v55  ;;  %v1324_v11 = vmul.f32 %v1320_v49, %v1315_v56  ;;  %v1303_v13 = vadd.f32 %v1299_v3, %v2376_v47  ;;  %v1304_v31 = vadd.f32 %v1300_v44, %v2378_v5 }
 0x226   : > { %v1338_v7 = vpop.permute.xlu1 %1337  ;;  %v1340_v2 = vpop.permute.xlu0 %1339  ;;  %v1327_v17 = vrot.slane %v1323_v19, 4  ;;  %v1328_v20 = vrot.slane %v1324_v11, 4 }
 0x227   : > { %v1341_v53 = vsel %vm977_vm2, %v1338_v7, %v1340_v2  ;;  %v1342_v54 = vsel %vm977_vm2, %v1340_v2, %v1338_v7 }
 0x228   : > { %v1347_v18 = vmul.f32 %v1343_v60, %v1342_v54  ;;  %v1348_v29 = vmul.f32 %v1344_v0, %v1341_v53  ;;  %v1331_v15 = vadd.f32 %v1327_v17, %v1303_v13  ;;  %v1332_v63 = vadd.f32 %v1328_v20, %v1304_v31  ;;  %v1731_v13 = vld [vmem:[%s2018_s14] sm:$0xff] }
 0x22a   : > { %v1362_v50 = vpop.permute.xlu1 %1361  ;;  %v1364_v14 = vpop.permute.xlu0 %1363  ;;  %v1351_v24 = vrot.slane %v1347_v18, 4  ;;  %v1352_v39 = vrot.slane %v1348_v29, 4 }
 0x22b   : > { %v1365_v4 = vsel %vm996_vm3, %v1362_v50, %v1364_v14  ;;  %v1366_v45 = vsel %vm996_vm3, %v1364_v14, %v1362_v50 }
 0x22c   : > { %v1371_v10 = vmul.f32 %v1367_v51, %v1366_v45  ;;  %v1372_v12 = vmul.f32 %v1368_v52, %v1365_v4  ;;  %v1355_v37 = vadd.f32 %v1351_v24, %v1331_v15  ;;  %v1356_v38 = vadd.f32 %v1352_v39, %v1332_v63 }
 0x22e   : > { %v1386_v9 = vpop.permute.xlu1 %1385  ;;  %v1388_v23 = vpop.permute.xlu0 %1387  ;;  %v1375_v36 = vrot.slane %v1371_v10, 4  ;;  %v1376_v22 = vrot.slane %v1372_v12, 4 }
 0x22f   : > { %v1389_v32 = vsel %vm1015_vm4, %v1386_v9, %v1388_v23  ;;  %v1390_v8 = vsel %vm1015_vm4, %v1388_v23, %v1386_v9  ;;  %v1478_v9 = vrot.slane %v2418_v42, %v2025_v25  ;;  %v1732_v25 = vld [vmem:[%s2034_s22] sm:$0xff]  ;;  %s2481_s22 = scalar_lea.hbm %s2533_s10, %s1615_s30 }
 0x230   : > { %v1395_v62 = vmul.f32 %v1391_v1, %v1389_v32  ;;  %v1396_v21 = vmul.f32 %v1392_v30, %v1390_v8  ;;  %v1379_v56 = vadd.f32 %v1375_v36, %v1355_v37  ;;  %v1380_v55 = vadd.f32 %v1376_v22, %v1356_v38 }
 0x231   : > { %v1493_v42 = vsub.f32 %v1732_v25, %v1731_v13 }
 0x232   : > { %v1410_v41 = vpop.permute.xlu1 %1409  ;;  %v1412_v35 = vpop.permute.xlu0 %1411  ;;  %v1399_v46 = vrot.slane %v1395_v62, 4  ;;  %v1400_v49 = vrot.slane %v1396_v21, 4 }
 0x233   : > { %v1413_v43 = vsel %vm1034_vm5, %v1410_v41, %v1412_v35  ;;  %v1414_v47 = vsel %vm1034_vm5, %v1412_v35, %v1410_v41 }
 0x234   : > { %v1419_v5 = vmul.f32 %v1415_v34, %v1413_v43  ;;  %v1420_v33 = vmul.f32 %v1416_v27, %v1414_v47  ;;  %v1403_v11 = vadd.f32 %v1399_v46, %v1379_v56  ;;  %v1404_v61 = vadd.f32 %v1400_v49, %v1380_v55 }
 0x235   : > { %v1503_v34 = vcombine.high %v1493_v42, %v1493_v42 }
 0x236   : > { %v1434_v7 = vpop.permute.xlu1 %1433  ;;  %v1436_v2 = vpop.permute.xlu0 %1435  ;;  %v1423_v60 = vrot.slane %v1419_v5, 4  ;;  %v1424_v0 = vrot.slane %v1420_v33, 4 }
 0x237   : > { %v1437_v58 = vsel %vm1053_vm6, %v1434_v7, %v1436_v2  ;;  %v1438_v59 = vsel %vm1053_vm6, %v1436_v2, %v1434_v7 }
 0x238   : > { %v1443_v19 = vmul.f32 %v1439_v40, %v1437_v58  ;;  %v1444_v6 = vmul.f32 %v1440_v48, %v1438_v59  ;;  %v1427_v3 = vadd.f32 %v1423_v60, %v1403_v11  ;;  %v1428_v44 = vadd.f32 %v1424_v0, %v1404_v61 }
 0x23a   : > { %v1447_v53 = vrot.slane %v1443_v19, 4  ;;  %v1448_v54 = vrot.slane %v1444_v6, 4  ;;  %v1456_v50 = vpop.permute.xlu1 %1455  ;;  %v1454_v14 = vpop.permute.xlu0 %1453 }
 0x23b   : > { %v1457_v51 = vsel %vm1072_vm7, %v1454_v14, %v1456_v50  ;;  %v1458_v52 = vsel %vm1072_vm7, %v1456_v50, %v1454_v14 }
 0x23c   : > { %v1459_v4 = vmul.f32 %v1457_v51, %v2310_v28  ;;  %v1460_v45 = vmul.f32 %v1458_v52, %v2315_v16  ;;  %v1451_v18 = vadd.f32 %v1447_v53, %v1427_v3  ;;  %v1452_v29 = vadd.f32 %v1448_v54, %v1428_v44 }
 0x23e   : > { %v1463_v17 = vrot.slane %v1459_v4, 4  ;;  %v1464_v20 = vrot.slane %v1460_v45, 4 }
 0x240   : > { %v1467_v1 = vadd.f32 %v1463_v17, %v1451_v18  ;;  %v1468_v30 = vadd.f32 %v1464_v20, %v1452_v29 }
 0x242   : > { %v1479_v57 = vadd.f32 %v1478_v9, %v1467_v1  ;;  %v1480_v23 = vadd.f32 %v1478_v9, %v1468_v30 }
 0x244   : > { %v1608_v10 = vmul.f32 -1.442695, %v1479_v57  ;;  %v1609_v12 = vmul.f32 -1.442695, %v1480_v23 }
 0x246   : > { %1723 = vpow2.f32 %v1608_v10 }
 0x247   : > { %1725 = vpow2.f32 %v1609_v12 }
 0x250   : > { %v1724_v28 = vpop.eup %1723 }
 0x251   : > { %v1726_v16 = vpop.eup %1725  ;;  %v1487_v32 = vadd.f32 1.0, %v1724_v28 }
 0x252   : > { %v1488_v8 = vadd.f32 1.0, %v1726_v16 }
 0x253   : > { %1727 = vrcp.f32 %v1487_v32 }
 0x254   : > { %1729 = vrcp.f32 %v1488_v8 }
 0x25d   : > { %v1728_v31 = vpop.eup %1727 }
 0x25e   : > { %v1730_v27 = vpop.eup %1729  ;;  %v1497_v24 = vrot.slane %v1728_v31, %v2027_v26 }
 0x25f   : > { %v1501_v39 = vrot.slane %v1730_v27, %v2027_v26 }
 0x260   : > { %v1505_v15 = vmul.f32 %v1497_v24, %v1493_v42 }
 0x261   : > { %v1506_v63 = vmul.f32 %v1503_v34, %v1501_v39 }
 0x263   : > { %v1509_v62 = vcombine.low %v1505_v15, %v1506_v63 }
 0x265   : > { %v1511_v21 = vadd.f32 %v1731_v13, %v1509_v62 }
 0x267   : > { %1512 = vst [vmem:[%s371_s11] sm:$0xff] %v1511_v21 }
 0x268   : > { %1746 = shalt.err (!%p1743_p3)
}
 0x269   : > { %s1747_s28 = scalar_lea.hbm %s2481_s22, 128  ;;  %s1751_s11 = scalar_lea.hbm %s2533_s10, 256 }
 0x26a   : > { %p1748_p4 = scmp.ne.s32.totalorder %s2481_s22, %s1747_s28  ;;  %p1752_p9 = scmp.lt.u32.totalorder %s2481_s22, %s2533_s10 }
 0x26b   : > { %p1753_p10 = scmp.lt.u32.totalorder %s1751_s11, %s1747_s28  ;;  %p1755_p12 = scmp.lt.u32.totalorder %s1747_s28, %s2481_s22 }
 0x26c   : > { %p1749_p7 = pnand %p1748_p4, %p1910_p5 }
 0x26d   : > { %p1754_p11 = por %p1753_p10, %p1752_p9 }
 0x26e   : > { %p1750_p8 = pneg %p1749_p7 }
 0x26f   : > { %p1756_p13 = por %p1755_p12, %p1754_p11 }
 0x271   : > { %p1757_p0 = pnand %p1756_p13, %p1750_p8 }
 0x273   : > { %1760 = shalt.err (!%p1757_p0)
}
 0x274   : > { %1616 = dma.vmem_to_hbm [thread:$0]  (%p1910_p5), %s2483_s12, 128, %s2481_s22, %s1514_s19  }
 0x275 PF: > { %p1622_p1 = scmp.ge.s32.totalorder %s1795_s18, 2  ;;  %s1540_s21 = sand.u32 1, %s1783_s15  }
 0x276   : > { %s1541_s8 = scalar_lea.sflag [#allocation4], %s1540_s21 }
 0x277   : > { %p1619_p2 = pnand %p1622_p1, %p1914_p6 }
 0x279   : > { %1778 = dma.done.wait (!%p1619_p2), %s1541_s8, 128  }
 0x27a   : > { %1780 = vsyncadd (!%p1619_p2), %s1541_s8, 4294967168  ;;  %p22_p3 = scmp.ge.s32.totalorder %s1897_s20, 4   ;;  %s2542_s15 = smov %s1787_s16 }
 0x27b   : > { %s2543_s16 = smov %s1791_s17  ;;  %s2544_s17 = smov %s1908_s23 }
 0x27c   : > { %s2545_s18 = smov %s1897_s20  ;;  %24 = sbr.rel (!%p22_p3) target bundleno = 6 (0x6), region = 98 }
 0x283   :  { %1546 = vsyncpa [#allocation4], 1 }
 0x284   :  { %1548 = vsyncpa [#allocation4 + $0x1], 1 }

</bundles_post_ra>
